<compile_context>
chip_gen: v7x
topology: tpu7x:2x2x1
jax: 0.10.0
libtpu: 0.0.40
codegen_flags: <defaults>
</compile_context>

<pallas_src>
import jax
import jax.numpy as jnp
from jax import lax
from jax.experimental import pallas as pl
from jax.experimental.pallas import tpu as pltpu

_VMEM_LIMIT = 32 * 1024 * 1024  # safe on v5e/v6e/v7x


def _round_up(x, m):
    return (x + m - 1) // m * m


# --------------------------------------------------------------------------
# Parallel blocked matmul + bias:  out = x @ w + b      (used for gates_x and
# the vocab projection).  Grid is ("parallel","parallel") so it megacore-shards.
# --------------------------------------------------------------------------
def _matmul_bias_kernel(x_ref, w_ref, b_ref, o_ref):
    o_ref[...] = (jnp.dot(x_ref[...], w_ref[...],
                          preferred_element_type=jnp.float32)
                  + b_ref[...]).astype(o_ref.dtype)


def _matmul_bias(x, w, b):
    """x: (M, K), w: (K, N), b: (N,) -> (M, N) float32."""
    M, K = x.shape
    N = w.shape[1]

    # Row (M) tiling: 128-row tiles when large, otherwise a single 8-aligned tile.
    if M > 128:
        Mp, tm = _round_up(M, 128), 128
    else:
        Mp = _round_up(M, 8)
        tm = Mp
    # Lane (N) tiling: pad to a multiple of 128, use up to 512-wide tiles.
    Np = _round_up(N, 128)
    tn = 512
    while Np % tn:
        tn //= 2

    xp = x if Mp == M else jnp.pad(x, ((0, Mp - M), (0, 0)))
    wp = w if Np == N else jnp.pad(w, ((0, 0), (0, Np - N)))
    bp = b.reshape(1, N)
    if Np != N:
        bp = jnp.pad(bp, ((0, 0), (0, Np - N)))

    out = pl.pallas_call(
        _matmul_bias_kernel,
        out_shape=jax.ShapeDtypeStruct((Mp, Np), jnp.float32),
        grid=(Mp // tm, Np // tn),
        in_specs=[
            pl.BlockSpec((tm, K), lambda i, j: (i, 0)),
            pl.BlockSpec((K, tn), lambda i, j: (0, j)),
            pl.BlockSpec((1, tn), lambda i, j: (0, j)),
        ],
        out_specs=pl.BlockSpec((tm, tn), lambda i, j: (i, j)),
        compiler_params=pltpu.CompilerParams(
            dimension_semantics=("parallel", "parallel"),
            vmem_limit_bytes=_VMEM_LIMIT,
        ),
    )(xp, wp, bp)
    return out[:M, :N]


# --------------------------------------------------------------------------
# Sequential LSTM recurrence: single invocation, in-kernel time loop.
#   gx_ref : (4, T, Bp, H)  precomputed x@W_ih + bias, gate-major
#   whh_ref: (4, H, H)      hidden-to-hidden weights, gate-major
#   h_all  : (T, Bp, H)     per-step hidden states (output slab)
# --------------------------------------------------------------------------
def _lstm_recurrence_kernel(gx_ref, whh_ref, h_all_ref):
    T, Bp, H = h_all_ref.shape

    def step(t, carry):
        h_prev, c_prev = carry

        def gate(k):
            # leading-axis indexes only: no lane-dim slicing
            return gx_ref[k, t] + jnp.dot(h_prev, whh_ref[k],
                                          preferred_element_type=jnp.float32)

        i_g = jax.nn.sigmoid(gate(0))
        f_g = jax.nn.sigmoid(gate(1))
        g_g = jnp.tanh(gate(2))
        o_g = jax.nn.sigmoid(gate(3))

        c_new = f_g * c_prev + i_g * g_g
        h_new = o_g * jnp.tanh(c_new)
        h_all_ref[t] = h_new
        return h_new, c_new

    h0 = jnp.zeros((Bp, H), jnp.float32)
    c0 = jnp.zeros((Bp, H), jnp.float32)
    lax.fori_loop(0, T, step, (h0, c0), unroll=(T <= 16))


def _lstm_recurrence(gx, T, Bp, H):
    return pl.pallas_call(
        _lstm_recurrence_kernel,
        out_shape=jax.ShapeDtypeStruct((T, Bp, H), jnp.float32),
        compiler_params=pltpu.CompilerParams(vmem_limit_bytes=_VMEM_LIMIT),
    )


# --------------------------------------------------------------------------
# Full forward pass (mirrors DecoderRNN.forward).
# --------------------------------------------------------------------------
def decoder_rnn_forward(features, captions, params):
    """features: (B, E) f32, captions: (B, L) int32 -> (B, L, V) f32."""
    B, E = features.shape
    H = params["w_hh"].shape[0]
    V = params["w_out"].shape[1]

    # ---- glue (plain JAX): embedding lookup + concat, time-major layout ----
    cap_emb = jnp.take(params["embedding"], captions[:, :-1], axis=0)   # (B, L-1, E)
    embed = jnp.concatenate([features[:, None, :], cap_emb], axis=1)     # (B, T, E)
    T = embed.shape[1]

    Bp = _round_up(max(B, 8), 8)                                         # sublane-align batch
    x_tm = jnp.transpose(embed, (1, 0, 2))                               # (T, B, E)
    if Bp != B:
        x_tm = jnp.pad(x_tm, ((0, 0), (0, Bp - B), (0, 0)))

    # ---- 1) hoisted input-to-hidden matmul for all timesteps ----
    bias = params["b_ih"] + params["b_hh"]                               # (4H,)
    gx_flat = _matmul_bias(x_tm.reshape(T * Bp, E), params["w_ih"], bias)  # (T*Bp, 4H)
    gx = jnp.transpose(gx_flat.reshape(T, Bp, 4, H), (2, 0, 1, 3))       # (4, T, Bp, H)

    # ---- 2) sequential recurrence (single kernel invocation) ----
    w_hh4 = jnp.transpose(params["w_hh"].reshape(H, 4, H), (1, 0, 2))    # (4, H, H)
    h_all = _lstm_recurrence(gx, T, Bp, H)(gx, w_hh4)                    # (T, Bp, H)

    # ---- 3) vocab projection as a parallel blocked matmul ----
    logits = _matmul_bias(h_all.reshape(T * Bp, H),
                          params["w_out"], params["b_out"])              # (T*Bp, V)
    logits = logits.reshape(T, Bp, V)[:, :B]                             # drop batch pad
    return jnp.transpose(logits, (1, 0, 2))                              # (B, T, V)


# --------------------------------------------------------------------------
# Pure-JAX reference mirroring the PyTorch module.
# --------------------------------------------------------------------------
def _reference_forward(features, captions, params):
    cap_emb = jnp.take(params["embedding"], captions[:, :-1], axis=0)
    embed = jnp.concatenate([features[:, None, :], cap_emb], axis=1)     # (B, T, E)
    H = params["w_hh"].shape[0]
    B = embed.shape[0]
    bias = params["b_ih"] + params["b_hh"]

    def step(carry, x_t):
        h, c = carry
        gates = x_t @ params["w_ih"] + h @ params["w_hh"] + bias
        i = jax.nn.sigmoid(gates[:, 0 * H:1 * H])
        f = jax.nn.sigmoid(gates[:, 1 * H:2 * H])
        g = jnp.tanh(gates[:, 2 * H:3 * H])
        o = jax.nn.sigmoid(gates[:, 3 * H:4 * H])
        c = f * c + i * g
        h = o * jnp.tanh(c)
        return (h, c), h

    h0 = jnp.zeros((B, H), jnp.float32)
    c0 = jnp.zeros((B, H), jnp.float32)
    _, hs = lax.scan(step, (h0, c0), jnp.transpose(embed, (1, 0, 2)))
    out = hs @ params["w_out"] + params["b_out"]                         # (T, B, V)
    return jnp.transpose(out, (1, 0, 2))


def init_params(key, embed_size, hidden_size, vocab_size):
    ks = jax.random.split(key, 7)
    scale = 0.1
    return {
        "embedding": scale * jax.random.normal(ks[0], (vocab_size, embed_size), jnp.float32),
        # Stored transposed vs. PyTorch: (E, 4H) / (H, 4H) for x @ W form,
        # gate column order i|f|g|o as in torch.nn.LSTM.
        "w_ih": scale * jax.random.normal(ks[1], (embed_size, 4 * hidden_size), jnp.float32),
        "w_hh": scale * jax.random.normal(ks[2], (hidden_size, 4 * hidden_size), jnp.float32),
        "b_ih": scale * jax.random.normal(ks[3], (4 * hidden_size,), jnp.float32),
        "b_hh": scale * jax.random.normal(ks[4], (4 * hidden_size,), jnp.float32),
        "w_out": scale * jax.random.normal(ks[5], (hidden_size, vocab_size), jnp.float32),
        "b_out": scale * jax.random.normal(ks[6], (vocab_size,), jnp.float32),
    }


if __name__ == "__main__":
    # Small shapes consistent with the module's forward().
    B, E, H, V, L = 2, 32, 32, 128, 8

    key = jax.random.PRNGKey(0)
    k_feat, k_cap, k_par = jax.random.split(key, 3)

    params = init_params(k_par, E, H, V)
    features = jax.random.normal(k_feat, (B, E), jnp.float32)            # image features
    captions = jax.random.randint(k_cap, (B, L), 0, V, dtype=jnp.int32)  # token ids

    out = jax.jit(decoder_rnn_forward)(features, captions, params)
    out = jax.block_until_ready(out)
    assert out.shape == (B, L, V), out.shape

    ref = jax.block_until_ready(_reference_forward(features, captions, params))
    assert jnp.allclose(out, ref, atol=1e-3, rtol=1e-3), \
        float(jnp.max(jnp.abs(out - ref)))

    # TODO(synk): sample() (greedy decode loop with .item()) is host-side control
    # flow and LogSoftmax is unused in forward(); neither is part of this kernel.
    print("KERNEL_OK")
</pallas_src>

<mosaic_0001>
module attributes {stable_mosaic.version = 11 : i64} {
  func.func @_matmul_bias_kernel(%arg0: i32, %arg1: i32, %arg2: memref<64x32xf32, #tpu.memory_space<vmem>>, %arg3: memref<32x128xf32, #tpu.memory_space<vmem>>, %arg4: memref<1x128xf32, #tpu.memory_space<vmem>>, %arg5: memref<64x128xf32, #tpu.memory_space<vmem>>) attributes {dimension_semantics = [#tpu.dimension_semantics<parallel>, #tpu.dimension_semantics<parallel>], iteration_bounds = array<i64: 1, 1>, scalar_prefetch = 0 : i64, scratch_operands = 0 : i64, tpu.core_type = #tpu.core_type<tc>, window_params = [{transform_indices = @transform_0, window_bounds = array<i64: 64, 32>}, {transform_indices = @transform_1, window_bounds = array<i64: 32, 128>}, {transform_indices = @transform_2, window_bounds = array<i64: 1, 128>}, {transform_indices = @transform_3, window_bounds = array<i64: 64, 128>}]} {
    %c0 = arith.constant 0 : index
    %c0_0 = arith.constant 0 : index
    %0 = vector.load %arg2[%c0, %c0_0] : memref<64x32xf32, #tpu.memory_space<vmem>>, vector<64x32xf32>
    %c0_1 = arith.constant 0 : index
    %c0_2 = arith.constant 0 : index
    %1 = vector.load %arg3[%c0_1, %c0_2] : memref<32x128xf32, #tpu.memory_space<vmem>>, vector<32x128xf32>
    %cst = arith.constant dense<0.000000e+00> : vector<64x128xf32>
    %2 = tpu.matmul %0, %1, %cst {dimension_numbers = #tpu.dot_dimension_numbers<[1], [0], [0], [1], [0, 0, 1, 1], [], []>} : vector<64x32xf32>, vector<32x128xf32>, vector<64x128xf32> -> vector<64x128xf32>
    %c0_3 = arith.constant 0 : index
    %c0_4 = arith.constant 0 : index
    %3 = vector.load %arg4[%c0_3, %c0_4] : memref<1x128xf32, #tpu.memory_space<vmem>>, vector<1x128xf32>
    %4 = vector.broadcast %3 : vector<1x128xf32> to vector<64x128xf32>
    %5 = arith.addf %2, %4 : vector<64x128xf32>
    %c0_5 = arith.constant 0 : index
    %c0_6 = arith.constant 0 : index
    %6 = vector.load %arg5[%c0_5, %c0_6] : memref<64x128xf32, #tpu.memory_space<vmem>>, vector<64x128xf32>
    tpu.vector_store %arg5[%c0_5, %c0_6], %5 {strides = array<i32>} : memref<64x128xf32, #tpu.memory_space<vmem>>, vector<64x128xf32>,
    return
  }
  func.func @transform_0(%arg0: i32, %arg1: i32) -> (i32, i32) {
    %c0_i32 = arith.constant 0 : i32
    %c0_i32_0 = arith.constant 0 : i32
    return %arg0, %c0_i32 : i32, i32
  }
  func.func @transform_1(%arg0: i32, %arg1: i32) -> (i32, i32) {
    %c0_i32 = arith.constant 0 : i32
    %c0_i32_0 = arith.constant 0 : i32
    return %c0_i32, %arg1 : i32, i32
  }
  func.func @transform_2(%arg0: i32, %arg1: i32) -> (i32, i32) {
    %c0_i32 = arith.constant 0 : i32
    %c0_i32_0 = arith.constant 0 : i32
    return %c0_i32, %arg1 : i32, i32
  }
  func.func @transform_3(%arg0: i32, %arg1: i32) -> (i32, i32) {
    %c0_i32 = arith.constant 0 : i32
    return %arg0, %arg1 : i32, i32
  }
}

module attributes {stable_mosaic.version = 11 : i64} {
  func.func @_lstm_recurrence_kernel(%arg0: memref<4x8x8x32xf32, #tpu.memory_space<vmem>>, %arg1: memref<4x32x32xf32, #tpu.memory_space<vmem>>, %arg2: memref<8x8x32xf32, #tpu.memory_space<vmem>>) attributes {dimension_semantics = [], scalar_prefetch = 0 : i64, scratch_operands = 0 : i64, tpu.core_type = #tpu.core_type<tc>} {
    %cst = arith.constant 0.000000e+00 : f32
    %0 = vector.broadcast %cst : f32 to vector<8x32xf32>
    %cst_0 = arith.constant 0.000000e+00 : f32
    %1 = vector.broadcast %cst_0 : f32 to vector<8x32xf32>
    %c0_i32 = arith.constant 0 : i32
    %c0 = arith.constant 0 : index
    %2 = arith.index_cast %c0_i32 : i32 to index
    %c0_1 = arith.constant 0 : index
    %c0_2 = arith.constant 0 : index
    %3 = vector.load %arg0[%c0, %2, %c0_1, %c0_2] : memref<4x8x8x32xf32, #tpu.memory_space<vmem>>, vector<1x1x8x32xf32>
    %4 = vector.shape_cast %3 : vector<1x1x8x32xf32> to vector<8x32xf32>
    %c0_3 = arith.constant 0 : index
    %c0_4 = arith.constant 0 : index
    %c0_5 = arith.constant 0 : index
    %5 = vector.load %arg1[%c0_3, %c0_4, %c0_5] : memref<4x32x32xf32, #tpu.memory_space<vmem>>, vector<1x32x32xf32>
    %6 = vector.shape_cast %5 : vector<1x32x32xf32> to vector<32x32xf32>
    %cst_6 = arith.constant dense<0.000000e+00> : vector<8x32xf32>
    %7 = tpu.matmul %0, %6, %cst_6 {dimension_numbers = #tpu.dot_dimension_numbers<[1], [0], [0], [1], [0, 0, 1, 1], [], []>} : vector<8x32xf32>, vector<32x32xf32>, vector<8x32xf32> -> vector<8x32xf32>
    %8 = arith.addf %4, %7 : vector<8x32xf32>
    %9 = arith.negf %8 : vector<8x32xf32>
    %10 = math.exp %9 : vector<8x32xf32>
    %cst_7 = arith.constant 1.000000e+00 : f32
    %11 = vector.broadcast %cst_7 : f32 to vector<8x32xf32>
    %12 = arith.addf %11, %10 : vector<8x32xf32>
    %13 = arith.divf %11, %12 : vector<8x32xf32>
    %c1 = arith.constant 1 : index
    %14 = arith.index_cast %c0_i32 : i32 to index
    %c0_8 = arith.constant 0 : index
    %c0_9 = arith.constant 0 : index
    %15 = vector.load %arg0[%c1, %14, %c0_8, %c0_9] : memref<4x8x8x32xf32, #tpu.memory_space<vmem>>, vector<1x1x8x32xf32>
    %16 = vector.shape_cast %15 : vector<1x1x8x32xf32> to vector<8x32xf32>
    %c1_10 = arith.constant 1 : index
    %c0_11 = arith.constant 0 : index
    %c0_12 = arith.constant 0 : index
    %17 = vector.load %arg1[%c1_10, %c0_11, %c0_12] : memref<4x32x32xf32, #tpu.memory_space<vmem>>, vector<1x32x32xf32>
    %18 = vector.shape_cast %17 : vector<1x32x32xf32> to vector<32x32xf32>
    %cst_13 = arith.constant dense<0.000000e+00> : vector<8x32xf32>
    %19 = tpu.matmul %0, %18, %cst_13 {dimension_numbers = #tpu.dot_dimension_numbers<[1], [0], [0], [1], [0, 0, 1, 1], [], []>} : vector<8x32xf32>, vector<32x32xf32>, vector<8x32xf32> -> vector<8x32xf32>
    %20 = arith.addf %16, %19 : vector<8x32xf32>
    %21 = arith.negf %20 : vector<8x32xf32>
    %22 = math.exp %21 : vector<8x32xf32>
    %cst_14 = arith.constant 1.000000e+00 : f32
    %23 = vector.broadcast %cst_14 : f32 to vector<8x32xf32>
    %24 = arith.addf %23, %22 : vector<8x32xf32>
    %25 = arith.divf %23, %24 : vector<8x32xf32>
    %c2 = arith.constant 2 : index
    %26 = arith.index_cast %c0_i32 : i32 to index
    %c0_15 = arith.constant 0 : index
    %c0_16 = arith.constant 0 : index
    %27 = vector.load %arg0[%c2, %26, %c0_15, %c0_16] : memref<4x8x8x32xf32, #tpu.memory_space<vmem>>, vector<1x1x8x32xf32>
    %28 = vector.shape_cast %27 : vector<1x1x8x32xf32> to vector<8x32xf32>
    %c2_17 = arith.constant 2 : index
    %c0_18 = arith.constant 0 : index
    %c0_19 = arith.constant 0 : index
    %29 = vector.load %arg1[%c2_17, %c0_18, %c0_19] : memref<4x32x32xf32, #tpu.memory_space<vmem>>, vector<1x32x32xf32>
    %30 = vector.shape_cast %29 : vector<1x32x32xf32> to vector<32x32xf32>
    %cst_20 = arith.constant dense<0.000000e+00> : vector<8x32xf32>
    %31 = tpu.matmul %0, %30, %cst_20 {dimension_numbers = #tpu.dot_dimension_numbers<[1], [0], [0], [1], [0, 0, 1, 1], [], []>} : vector<8x32xf32>, vector<32x32xf32>, vector<8x32xf32> -> vector<8x32xf32>
    %32 = arith.addf %28, %31 : vector<8x32xf32>
    %33 = math.tanh %32 : vector<8x32xf32>
    %c3 = arith.constant 3 : index
    %34 = arith.index_cast %c0_i32 : i32 to index
    %c0_21 = arith.constant 0 : index
    %c0_22 = arith.constant 0 : index
    %35 = vector.load %arg0[%c3, %34, %c0_21, %c0_22] : memref<4x8x8x32xf32, #tpu.memory_space<vmem>>, vector<1x1x8x32xf32>
    %36 = vector.shape_cast %35 : vector<1x1x8x32xf32> to vector<8x32xf32>
    %c3_23 = arith.constant 3 : index
    %c0_24 = arith.constant 0 : index
    %c0_25 = arith.constant 0 : index
    %37 = vector.load %arg1[%c3_23, %c0_24, %c0_25] : memref<4x32x32xf32, #tpu.memory_space<vmem>>, vector<1x32x32xf32>
    %38 = vector.shape_cast %37 : vector<1x32x32xf32> to vector<32x32xf32>
    %cst_26 = arith.constant dense<0.000000e+00> : vector<8x32xf32>
    %39 = tpu.matmul %0, %38, %cst_26 {dimension_numbers = #tpu.dot_dimension_numbers<[1], [0], [0], [1], [0, 0, 1, 1], [], []>} : vector<8x32xf32>, vector<32x32xf32>, vector<8x32xf32> -> vector<8x32xf32>
    %40 = arith.addf %36, %39 : vector<8x32xf32>
    %41 = arith.negf %40 : vector<8x32xf32>
    %42 = math.exp %41 : vector<8x32xf32>
    %cst_27 = arith.constant 1.000000e+00 : f32
    %43 = vector.broadcast %cst_27 : f32 to vector<8x32xf32>
    %44 = arith.addf %43, %42 : vector<8x32xf32>
    %45 = arith.divf %43, %44 : vector<8x32xf32>
    %46 = arith.mulf %25, %1 : vector<8x32xf32>
    %47 = arith.mulf %13, %33 : vector<8x32xf32>
    %48 = arith.addf %46, %47 : vector<8x32xf32>
    %49 = math.tanh %48 : vector<8x32xf32>
    %50 = arith.mulf %45, %49 : vector<8x32xf32>
    %51 = arith.index_cast %c0_i32 : i32 to index
    %c0_28 = arith.constant 0 : index
    %c0_29 = arith.constant 0 : index
    %52 = vector.load %arg2[%51, %c0_28, %c0_29] : memref<8x8x32xf32, #tpu.memory_space<vmem>>, vector<1x8x32xf32>
    %53 = vector.shape_cast %52 : vector<1x8x32xf32> to vector<8x32xf32>
    %54 = vector.shape_cast %50 : vector<8x32xf32> to vector<1x8x32xf32>
    tpu.vector_store %arg2[%51, %c0_28, %c0_29], %54 {strides = array<i32>} : memref<8x8x32xf32, #tpu.memory_space<vmem>>, vector<1x8x32xf32>,
    %c1_i32 = arith.constant 1 : i32
    %c0_30 = arith.constant 0 : index
    %55 = arith.index_cast %c1_i32 : i32 to index
    %c0_31 = arith.constant 0 : index
    %c0_32 = arith.constant 0 : index
    %56 = vector.load %arg0[%c0_30, %55, %c0_31, %c0_32] : memref<4x8x8x32xf32, #tpu.memory_space<vmem>>, vector<1x1x8x32xf32>
    %57 = vector.shape_cast %56 : vector<1x1x8x32xf32> to vector<8x32xf32>
    %c0_33 = arith.constant 0 : index
    %c0_34 = arith.constant 0 : index
    %c0_35 = arith.constant 0 : index
    %58 = vector.load %arg1[%c0_33, %c0_34, %c0_35] : memref<4x32x32xf32, #tpu.memory_space<vmem>>, vector<1x32x32xf32>
    %59 = vector.shape_cast %58 : vector<1x32x32xf32> to vector<32x32xf32>
    %cst_36 = arith.constant dense<0.000000e+00> : vector<8x32xf32>
    %60 = tpu.matmul %50, %59, %cst_36 {dimension_numbers = #tpu.dot_dimension_numbers<[1], [0], [0], [1], [0, 0, 1, 1], [], []>} : vector<8x32xf32>, vector<32x32xf32>, vector<8x32xf32> -> vector<8x32xf32>
    %61 = arith.addf %57, %60 : vector<8x32xf32>
    %62 = arith.negf %61 : vector<8x32xf32>
    %63 = math.exp %62 : vector<8x32xf32>
    %cst_37 = arith.constant 1.000000e+00 : f32
    %64 = vector.broadcast %cst_37 : f32 to vector<8x32xf32>
    %65 = arith.addf %64, %63 : vector<8x32xf32>
    %66 = arith.divf %64, %65 : vector<8x32xf32>
    %c1_38 = arith.constant 1 : index
    %67 = arith.index_cast %c1_i32 : i32 to index
    %c0_39 = arith.constant 0 : index
    %c0_40 = arith.constant 0 : index
    %68 = vector.load %arg0[%c1_38, %67, %c0_39, %c0_40] : memref<4x8x8x32xf32, #tpu.memory_space<vmem>>, vector<1x1x8x32xf32>
    %69 = vector.shape_cast %68 : vector<1x1x8x32xf32> to vector<8x32xf32>
    %c1_41 = arith.constant 1 : index
    %c0_42 = arith.constant 0 : index
    %c0_43 = arith.constant 0 : index
    %70 = vector.load %arg1[%c1_41, %c0_42, %c0_43] : memref<4x32x32xf32, #tpu.memory_space<vmem>>, vector<1x32x32xf32>
    %71 = vector.shape_cast %70 : vector<1x32x32xf32> to vector<32x32xf32>
    %cst_44 = arith.constant dense<0.000000e+00> : vector<8x32xf32>
    %72 = tpu.matmul %50, %71, %cst_44 {dimension_numbers = #tpu.dot_dimension_numbers<[1], [0], [0], [1], [0, 0, 1, 1], [], []>} : vector<8x32xf32>, vector<32x32xf32>, vector<8x32xf32> -> vector<8x32xf32>
    %73 = arith.addf %69, %72 : vector<8x32xf32>
    %74 = arith.negf %73 : vector<8x32xf32>
    %75 = math.exp %74 : vector<8x32xf32>
    %cst_45 = arith.constant 1.000000e+00 : f32
    %76 = vector.broadcast %cst_45 : f32 to vector<8x32xf32>
    %77 = arith.addf %76, %75 : vector<8x32xf32>
    %78 = arith.divf %76, %77 : vector<8x32xf32>
    %c2_46 = arith.constant 2 : index
    %79 = arith.index_cast %c1_i32 : i32 to index
    %c0_47 = arith.constant 0 : index
    %c0_48 = arith.constant 0 : index
    %80 = vector.load %arg0[%c2_46, %79, %c0_47, %c0_48] : memref<4x8x8x32xf32, #tpu.memory_space<vmem>>, vector<1x1x8x32xf32>
    %81 = vector.shape_cast %80 : vector<1x1x8x32xf32> to vector<8x32xf32>
    %c2_49 = arith.constant 2 : index
    %c0_50 = arith.constant 0 : index
    %c0_51 = arith.constant 0 : index
    %82 = vector.load %arg1[%c2_49, %c0_50, %c0_51] : memref<4x32x32xf32, #tpu.memory_space<vmem>>, vector<1x32x32xf32>
    %83 = vector.shape_cast %82 : vector<1x32x32xf32> to vector<32x32xf32>
    %cst_52 = arith.constant dense<0.000000e+00> : vector<8x32xf32>
    %84 = tpu.matmul %50, %83, %cst_52 {dimension_numbers = #tpu.dot_dimension_numbers<[1], [0], [0], [1], [0, 0, 1, 1], [], []>} : vector<8x32xf32>, vector<32x32xf32>, vector<8x32xf32> -> vector<8x32xf32>
    %85 = arith.addf %81, %84 : vector<8x32xf32>
    %86 = math.tanh %85 : vector<8x32xf32>
    %c3_53 = arith.constant 3 : index
    %87 = arith.index_cast %c1_i32 : i32 to index
    %c0_54 = arith.constant 0 : index
    %c0_55 = arith.constant 0 : index
    %88 = vector.load %arg0[%c3_53, %87, %c0_54, %c0_55] : memref<4x8x8x32xf32, #tpu.memory_space<vmem>>, vector<1x1x8x32xf32>
    %89 = vector.shape_cast %88 : vector<1x1x8x32xf32> to vector<8x32xf32>
    %c3_56 = arith.constant 3 : index
    %c0_57 = arith.constant 0 : index
    %c0_58 = arith.constant 0 : index
    %90 = vector.load %arg1[%c3_56, %c0_57, %c0_58] : memref<4x32x32xf32, #tpu.memory_space<vmem>>, vector<1x32x32xf32>
    %91 = vector.shape_cast %90 : vector<1x32x32xf32> to vector<32x32xf32>
    %cst_59 = arith.constant dense<0.000000e+00> : vector<8x32xf32>
    %92 = tpu.matmul %50, %91, %cst_59 {dimension_numbers = #tpu.dot_dimension_numbers<[1], [0], [0], [1], [0, 0, 1, 1], [], []>} : vector<8x32xf32>, vector<32x32xf32>, vector<8x32xf32> -> vector<8x32xf32>
    %93 = arith.addf %89, %92 : vector<8x32xf32>
    %94 = arith.negf %93 : vector<8x32xf32>
    %95 = math.exp %94 : vector<8x32xf32>
    %cst_60 = arith.constant 1.000000e+00 : f32
    %96 = vector.broadcast %cst_60 : f32 to vector<8x32xf32>
    %97 = arith.addf %96, %95 : vector<8x32xf32>
    %98 = arith.divf %96, %97 : vector<8x32xf32>
    %99 = arith.mulf %78, %48 : vector<8x32xf32>
    %100 = arith.mulf %66, %86 : vector<8x32xf32>
    %101 = arith.addf %99, %100 : vector<8x32xf32>
    %102 = math.tanh %101 : vector<8x32xf32>
    %103 = arith.mulf %98, %102 : vector<8x32xf32>
    %104 = arith.index_cast %c1_i32 : i32 to index
    %c0_61 = arith.constant 0 : index
    %c0_62 = arith.constant 0 : index
    %105 = vector.load %arg2[%104, %c0_61, %c0_62] : memref<8x8x32xf32, #tpu.memory_space<vmem>>, vector<1x8x32xf32>
    %106 = vector.shape_cast %105 : vector<1x8x32xf32> to vector<8x32xf32>
    %107 = vector.shape_cast %103 : vector<8x32xf32> to vector<1x8x32xf32>
    tpu.vector_store %arg2[%104, %c0_61, %c0_62], %107 {strides = array<i32>} : memref<8x8x32xf32, #tpu.memory_space<vmem>>, vector<1x8x32xf32>,
    %c2_i32 = arith.constant 2 : i32
    %c0_63 = arith.constant 0 : index
    %108 = arith.index_cast %c2_i32 : i32 to index
    %c0_64 = arith.constant 0 : index
    %c0_65 = arith.constant 0 : index
    %109 = vector.load %arg0[%c0_63, %108, %c0_64, %c0_65] : memref<4x8x8x32xf32, #tpu.memory_space<vmem>>, vector<1x1x8x32xf32>
    %110 = vector.shape_cast %109 : vector<1x1x8x32xf32> to vector<8x32xf32>
    %c0_66 = arith.constant 0 : index
    %c0_67 = arith.constant 0 : index
    %c0_68 = arith.constant 0 : index
    %111 = vector.load %arg1[%c0_66, %c0_67, %c0_68] : memref<4x32x32xf32, #tpu.memory_space<vmem>>, vector<1x32x32xf32>
    %112 = vector.shape_cast %111 : vector<1x32x32xf32> to vector<32x32xf32>
    %cst_69 = arith.constant dense<0.000000e+00> : vector<8x32xf32>
    %113 = tpu.matmul %103, %112, %cst_69 {dimension_numbers = #tpu.dot_dimension_numbers<[1], [0], [0], [1], [0, 0, 1, 1], [], []>} : vector<8x32xf32>, vector<32x32xf32>, vector<8x32xf32> -> vector<8x32xf32>
    %114 = arith.addf %110, %113 : vector<8x32xf32>
    %115 = arith.negf %114 : vector<8x32xf32>
    %116 = math.exp %115 : vector<8x32xf32>
    %cst_70 = arith.constant 1.000000e+00 : f32
    %117 = vector.broadcast %cst_70 : f32 to vector<8x32xf32>
    %118 = arith.addf %117, %116 : vector<8x32xf32>
    %119 = arith.divf %117, %118 : vector<8x32xf32>
    %c1_71 = arith.constant 1 : index
    %120 = arith.index_cast %c2_i32 : i32 to index
    %c0_72 = arith.constant 0 : index
    %c0_73 = arith.constant 0 : index
    %121 = vector.load %arg0[%c1_71, %120, %c0_72, %c0_73] : memref<4x8x8x32xf32, #tpu.memory_space<vmem>>, vector<1x1x8x32xf32>
    %122 = vector.shape_cast %121 : vector<1x1x8x32xf32> to vector<8x32xf32>
    %c1_74 = arith.constant 1 : index
    %c0_75 = arith.constant 0 : index
    %c0_76 = arith.constant 0 : index
    %123 = vector.load %arg1[%c1_74, %c0_75, %c0_76] : memref<4x32x32xf32, #tpu.memory_space<vmem>>, vector<1x32x32xf32>
    %124 = vector.shape_cast %123 : vector<1x32x32xf32> to vector<32x32xf32>
    %cst_77 = arith.constant dense<0.000000e+00> : vector<8x32xf32>
    %125 = tpu.matmul %103, %124, %cst_77 {dimension_numbers = #tpu.dot_dimension_numbers<[1], [0], [0], [1], [0, 0, 1, 1], [], []>} : vector<8x32xf32>, vector<32x32xf32>, vector<8x32xf32> -> vector<8x32xf32>
    %126 = arith.addf %122, %125 : vector<8x32xf32>
    %127 = arith.negf %126 : vector<8x32xf32>
    %128 = math.exp %127 : vector<8x32xf32>
    %cst_78 = arith.constant 1.000000e+00 : f32
    %129 = vector.broadcast %cst_78 : f32 to vector<8x32xf32>
    %130 = arith.addf %129, %128 : vector<8x32xf32>
    %131 = arith.divf %129, %130 : vector<8x32xf32>
    %c2_79 = arith.constant 2 : index
    %132 = arith.index_cast %c2_i32 : i32 to index
    %c0_80 = arith.constant 0 : index
    %c0_81 = arith.constant 0 : index
    %133 = vector.load %arg0[%c2_79, %132, %c0_80, %c0_81] : memref<4x8x8x32xf32, #tpu.memory_space<vmem>>, vector<1x1x8x32xf32>
    %134 = vector.shape_cast %133 : vector<1x1x8x32xf32> to vector<8x32xf32>
    %c2_82 = arith.constant 2 : index
    %c0_83 = arith.constant 0 : index
    %c0_84 = arith.constant 0 : index
    %135 = vector.load %arg1[%c2_82, %c0_83, %c0_84] : memref<4x32x32xf32, #tpu.memory_space<vmem>>, vector<1x32x32xf32>
    %136 = vector.shape_cast %135 : vector<1x32x32xf32> to vector<32x32xf32>
    %cst_85 = arith.constant dense<0.000000e+00> : vector<8x32xf32>
    %137 = tpu.matmul %103, %136, %cst_85 {dimension_numbers = #tpu.dot_dimension_numbers<[1], [0], [0], [1], [0, 0, 1, 1], [], []>} : vector<8x32xf32>, vector<32x32xf32>, vector<8x32xf32> -> vector<8x32xf32>
    %138 = arith.addf %134, %137 : vector<8x32xf32>
    %139 = math.tanh %138 : vector<8x32xf32>
    %c3_86 = arith.constant 3 : index
    %140 = arith.index_cast %c2_i32 : i32 to index
    %c0_87 = arith.constant 0 : index
    %c0_88 = arith.constant 0 : index
    %141 = vector.load %arg0[%c3_86, %140, %c0_87, %c0_88] : memref<4x8x8x32xf32, #tpu.memory_space<vmem>>, vector<1x1x8x32xf32>
    %142 = vector.shape_cast %141 : vector<1x1x8x32xf32> to vector<8x32xf32>
    %c3_89 = arith.constant 3 : index
    %c0_90 = arith.constant 0 : index
    %c0_91 = arith.constant 0 : index
    %143 = vector.load %arg1[%c3_89, %c0_90, %c0_91] : memref<4x32x32xf32, #tpu.memory_space<vmem>>, vector<1x32x32xf32>
    %144 = vector.shape_cast %143 : vector<1x32x32xf32> to vector<32x32xf32>
    %cst_92 = arith.constant dense<0.000000e+00> : vector<8x32xf32>
    %145 = tpu.matmul %103, %144, %cst_92 {dimension_numbers = #tpu.dot_dimension_numbers<[1], [0], [0], [1], [0, 0, 1, 1], [], []>} : vector<8x32xf32>, vector<32x32xf32>, vector<8x32xf32> -> vector<8x32xf32>
    %146 = arith.addf %142, %145 : vector<8x32xf32>
    %147 = arith.negf %146 : vector<8x32xf32>
    %148 = math.exp %147 : vector<8x32xf32>
    %cst_93 = arith.constant 1.000000e+00 : f32
    %149 = vector.broadcast %cst_93 : f32 to vector<8x32xf32>
    %150 = arith.addf %149, %148 : vector<8x32xf32>
    %151 = arith.divf %149, %150 : vector<8x32xf32>
    %152 = arith.mulf %131, %101 : vector<8x32xf32>
    %153 = arith.mulf %119, %139 : vector<8x32xf32>
    %154 = arith.addf %152, %153 : vector<8x32xf32>
    %155 = math.tanh %154 : vector<8x32xf32>
    %156 = arith.mulf %151, %155 : vector<8x32xf32>
    %157 = arith.index_cast %c2_i32 : i32 to index
    %c0_94 = arith.constant 0 : index
    %c0_95 = arith.constant 0 : index
    %158 = vector.load %arg2[%157, %c0_94, %c0_95] : memref<8x8x32xf32, #tpu.memory_space<vmem>>, vector<1x8x32xf32>
    %159 = vector.shape_cast %158 : vector<1x8x32xf32> to vector<8x32xf32>
    %160 = vector.shape_cast %156 : vector<8x32xf32> to vector<1x8x32xf32>
    tpu.vector_store %arg2[%157, %c0_94, %c0_95], %160 {strides = array<i32>} : memref<8x8x32xf32, #tpu.memory_space<vmem>>, vector<1x8x32xf32>,
    %c3_i32 = arith.constant 3 : i32
    %c0_96 = arith.constant 0 : index
    %161 = arith.index_cast %c3_i32 : i32 to index
    %c0_97 = arith.constant 0 : index
    %c0_98 = arith.constant 0 : index
    %162 = vector.load %arg0[%c0_96, %161, %c0_97, %c0_98] : memref<4x8x8x32xf32, #tpu.memory_space<vmem>>, vector<1x1x8x32xf32>
    %163 = vector.shape_cast %162 : vector<1x1x8x32xf32> to vector<8x32xf32>
    %c0_99 = arith.constant 0 : index
    %c0_100 = arith.constant 0 : index
    %c0_101 = arith.constant 0 : index
    %164 = vector.load %arg1[%c0_99, %c0_100, %c0_101] : memref<4x32x32xf32, #tpu.memory_space<vmem>>, vector<1x32x32xf32>
    %165 = vector.shape_cast %164 : vector<1x32x32xf32> to vector<32x32xf32>
    %cst_102 = arith.constant dense<0.000000e+00> : vector<8x32xf32>
    %166 = tpu.matmul %156, %165, %cst_102 {dimension_numbers = #tpu.dot_dimension_numbers<[1], [0], [0], [1], [0, 0, 1, 1], [], []>} : vector<8x32xf32>, vector<32x32xf32>, vector<8x32xf32> -> vector<8x32xf32>
    %167 = arith.addf %163, %166 : vector<8x32xf32>
    %168 = arith.negf %167 : vector<8x32xf32>
    %169 = math.exp %168 : vector<8x32xf32>
    %cst_103 = arith.constant 1.000000e+00 : f32
    %170 = vector.broadcast %cst_103 : f32 to vector<8x32xf32>
    %171 = arith.addf %170, %169 : vector<8x32xf32>
    %172 = arith.divf %170, %171 : vector<8x32xf32>
    %c1_104 = arith.constant 1 : index
    %173 = arith.index_cast %c3_i32 : i32 to index
    %c0_105 = arith.constant 0 : index
    %c0_106 = arith.constant 0 : index
    %174 = vector.load %arg0[%c1_104, %173, %c0_105, %c0_106] : memref<4x8x8x32xf32, #tpu.memory_space<vmem>>, vector<1x1x8x32xf32>
    %175 = vector.shape_cast %174 : vector<1x1x8x32xf32> to vector<8x32xf32>
    %c1_107 = arith.constant 1 : index
    %c0_108 = arith.constant 0 : index
    %c0_109 = arith.constant 0 : index
    %176 = vector.load %arg1[%c1_107, %c0_108, %c0_109] : memref<4x32x32xf32, #tpu.memory_space<vmem>>, vector<1x32x32xf32>
    %177 = vector.shape_cast %176 : vector<1x32x32xf32> to vector<32x32xf32>
    %cst_110 = arith.constant dense<0.000000e+00> : vector<8x32xf32>
    %178 = tpu.matmul %156, %177, %cst_110 {dimension_numbers = #tpu.dot_dimension_numbers<[1], [0], [0], [1], [0, 0, 1, 1], [], []>} : vector<8x32xf32>, vector<32x32xf32>, vector<8x32xf32> -> vector<8x32xf32>
    %179 = arith.addf %175, %178 : vector<8x32xf32>
    %180 = arith.negf %179 : vector<8x32xf32>
    %181 = math.exp %180 : vector<8x32xf32>
    %cst_111 = arith.constant 1.000000e+00 : f32
    %182 = vector.broadcast %cst_111 : f32 to vector<8x32xf32>
    %183 = arith.addf %182, %181 : vector<8x32xf32>
    %184 = arith.divf %182, %183 : vector<8x32xf32>
    %c2_112 = arith.constant 2 : index
    %185 = arith.index_cast %c3_i32 : i32 to index
    %c0_113 = arith.constant 0 : index
    %c0_114 = arith.constant 0 : index
    %186 = vector.load %arg0[%c2_112, %185, %c0_113, %c0_114] : memref<4x8x8x32xf32, #tpu.memory_space<vmem>>, vector<1x1x8x32xf32>
    %187 = vector.shape_cast %186 : vector<1x1x8x32xf32> to vector<8x32xf32>
    %c2_115 = arith.constant 2 : index
    %c0_116 = arith.constant 0 : index
    %c0_117 = arith.constant 0 : index
    %188 = vector.load %arg1[%c2_115, %c0_116, %c0_117] : memref<4x32x32xf32, #tpu.memory_space<vmem>>, vector<1x32x32xf32>
    %189 = vector.shape_cast %188 : vector<1x32x32xf32> to vector<32x32xf32>
    %cst_118 = arith.constant dense<0.000000e+00> : vector<8x32xf32>
    %190 = tpu.matmul %156, %189, %cst_118 {dimension_numbers = #tpu.dot_dimension_numbers<[1], [0], [0], [1], [0, 0, 1, 1], [], []>} : vector<8x32xf32>, vector<32x32xf32>, vector<8x32xf32> -> vector<8x32xf32>
    %191 = arith.addf %187, %190 : vector<8x32xf32>
    %192 = math.tanh %191 : vector<8x32xf32>
    %c3_119 = arith.constant 3 : index
    %193 = arith.index_cast %c3_i32 : i32 to index
    %c0_120 = arith.constant 0 : index
    %c0_121 = arith.constant 0 : index
    %194 = vector.load %arg0[%c3_119, %193, %c0_120, %c0_121] : memref<4x8x8x32xf32, #tpu.memory_space<vmem>>, vector<1x1x8x32xf32>
    %195 = vector.shape_cast %194 : vector<1x1x8x32xf32> to vector<8x32xf32>
    %c3_122 = arith.constant 3 : index
    %c0_123 = arith.constant 0 : index
    %c0_124 = arith.constant 0 : index
    %196 = vector.load %arg1[%c3_122, %c0_123, %c0_124] : memref<4x32x32xf32, #tpu.memory_space<vmem>>, vector<1x32x32xf32>
    %197 = vector.shape_cast %196 : vector<1x32x32xf32> to vector<32x32xf32>
    %cst_125 = arith.constant dense<0.000000e+00> : vector<8x32xf32>
    %198 = tpu.matmul %156, %197, %cst_125 {dimension_numbers = #tpu.dot_dimension_numbers<[1], [0], [0], [1], [0, 0, 1, 1], [], []>} : vector<8x32xf32>, vector<32x32xf32>, vector<8x32xf32> -> vector<8x32xf32>
    %199 = arith.addf %195, %198 : vector<8x32xf32>
    %200 = arith.negf %199 : vector<8x32xf32>
    %201 = math.exp %200 : vector<8x32xf32>
    %cst_126 = arith.constant 1.000000e+00 : f32
    %202 = vector.broadcast %cst_126 : f32 to vector<8x32xf32>
    %203 = arith.addf %202, %201 : vector<8x32xf32>
    %204 = arith.divf %202, %203 : vector<8x32xf32>
    %205 = arith.mulf %184, %154 : vector<8x32xf32>
    %206 = arith.mulf %172, %192 : vector<8x32xf32>
    %207 = arith.addf %205, %206 : vector<8x32xf32>
    %208 = math.tanh %207 : vector<8x32xf32>
    %209 = arith.mulf %204, %208 : vector<8x32xf32>
    %210 = arith.index_cast %c3_i32 : i32 to index
    %c0_127 = arith.constant 0 : index
    %c0_128 = arith.constant 0 : index
    %211 = vector.load %arg2[%210, %c0_127, %c0_128] : memref<8x8x32xf32, #tpu.memory_space<vmem>>, vector<1x8x32xf32>
    %212 = vector.shape_cast %211 : vector<1x8x32xf32> to vector<8x32xf32>
    %213 = vector.shape_cast %209 : vector<8x32xf32> to vector<1x8x32xf32>
    tpu.vector_store %arg2[%210, %c0_127, %c0_128], %213 {strides = array<i32>} : memref<8x8x32xf32, #tpu.memory_space<vmem>>, vector<1x8x32xf32>,
    %c4_i32 = arith.constant 4 : i32
    %c0_129 = arith.constant 0 : index
    %214 = arith.index_cast %c4_i32 : i32 to index
    %c0_130 = arith.constant 0 : index
    %c0_131 = arith.constant 0 : index
    %215 = vector.load %arg0[%c0_129, %214, %c0_130, %c0_131] : memref<4x8x8x32xf32, #tpu.memory_space<vmem>>, vector<1x1x8x32xf32>
    %216 = vector.shape_cast %215 : vector<1x1x8x32xf32> to vector<8x32xf32>
    %c0_132 = arith.constant 0 : index
    %c0_133 = arith.constant 0 : index
    %c0_134 = arith.constant 0 : index
    %217 = vector.load %arg1[%c0_132, %c0_133, %c0_134] : memref<4x32x32xf32, #tpu.memory_space<vmem>>, vector<1x32x32xf32>
    %218 = vector.shape_cast %217 : vector<1x32x32xf32> to vector<32x32xf32>
    %cst_135 = arith.constant dense<0.000000e+00> : vector<8x32xf32>
    %219 = tpu.matmul %209, %218, %cst_135 {dimension_numbers = #tpu.dot_dimension_numbers<[1], [0], [0], [1], [0, 0, 1, 1], [], []>} : vector<8x32xf32>, vector<32x32xf32>, vector<8x32xf32> -> vector<8x32xf32>
    %220 = arith.addf %216, %219 : vector<8x32xf32>
    %221 = arith.negf %220 : vector<8x32xf32>
    %222 = math.exp %221 : vector<8x32xf32>
    %cst_136 = arith.constant 1.000000e+00 : f32
    %223 = vector.broadcast %cst_136 : f32 to vector<8x32xf32>
    %224 = arith.addf %223, %222 : vector<8x32xf32>
    %225 = arith.divf %223, %224 : vector<8x32xf32>
    %c1_137 = arith.constant 1 : index
    %226 = arith.index_cast %c4_i32 : i32 to index
    %c0_138 = arith.constant 0 : index
    %c0_139 = arith.constant 0 : index
    %227 = vector.load %arg0[%c1_137, %226, %c0_138, %c0_139] : memref<4x8x8x32xf32, #tpu.memory_space<vmem>>, vector<1x1x8x32xf32>
    %228 = vector.shape_cast %227 : vector<1x1x8x32xf32> to vector<8x32xf32>
    %c1_140 = arith.constant 1 : index
    %c0_141 = arith.constant 0 : index
    %c0_142 = arith.constant 0 : index
    %229 = vector.load %arg1[%c1_140, %c0_141, %c0_142] : memref<4x32x32xf32, #tpu.memory_space<vmem>>, vector<1x32x32xf32>
    %230 = vector.shape_cast %229 : vector<1x32x32xf32> to vector<32x32xf32>
    %cst_143 = arith.constant dense<0.000000e+00> : vector<8x32xf32>
    %231 = tpu.matmul %209, %230, %cst_143 {dimension_numbers = #tpu.dot_dimension_numbers<[1], [0], [0], [1], [0, 0, 1, 1], [], []>} : vector<8x32xf32>, vector<32x32xf32>, vector<8x32xf32> -> vector<8x32xf32>
    %232 = arith.addf %228, %231 : vector<8x32xf32>
    %233 = arith.negf %232 : vector<8x32xf32>
    %234 = math.exp %233 : vector<8x32xf32>
    %cst_144 = arith.constant 1.000000e+00 : f32
    %235 = vector.broadcast %cst_144 : f32 to vector<8x32xf32>
    %236 = arith.addf %235, %234 : vector<8x32xf32>
    %237 = arith.divf %235, %236 : vector<8x32xf32>
    %c2_145 = arith.constant 2 : index
    %238 = arith.index_cast %c4_i32 : i32 to index
    %c0_146 = arith.constant 0 : index
    %c0_147 = arith.constant 0 : index
    %239 = vector.load %arg0[%c2_145, %238, %c0_146, %c0_147] : memref<4x8x8x32xf32, #tpu.memory_space<vmem>>, vector<1x1x8x32xf32>
    %240 = vector.shape_cast %239 : vector<1x1x8x32xf32> to vector<8x32xf32>
    %c2_148 = arith.constant 2 : index
    %c0_149 = arith.constant 0 : index
    %c0_150 = arith.constant 0 : index
    %241 = vector.load %arg1[%c2_148, %c0_149, %c0_150] : memref<4x32x32xf32, #tpu.memory_space<vmem>>, vector<1x32x32xf32>
    %242 = vector.shape_cast %241 : vector<1x32x32xf32> to vector<32x32xf32>
    %cst_151 = arith.constant dense<0.000000e+00> : vector<8x32xf32>
    %243 = tpu.matmul %209, %242, %cst_151 {dimension_numbers = #tpu.dot_dimension_numbers<[1], [0], [0], [1], [0, 0, 1, 1], [], []>} : vector<8x32xf32>, vector<32x32xf32>, vector<8x32xf32> -> vector<8x32xf32>
    %244 = arith.addf %240, %243 : vector<8x32xf32>
    %245 = math.tanh %244 : vector<8x32xf32>
    %c3_152 = arith.constant 3 : index
    %246 = arith.index_cast %c4_i32 : i32 to index
    %c0_153 = arith.constant 0 : index
    %c0_154 = arith.constant 0 : index
    %247 = vector.load %arg0[%c3_152, %246, %c0_153, %c0_154] : memref<4x8x8x32xf32, #tpu.memory_space<vmem>>, vector<1x1x8x32xf32>
    %248 = vector.shape_cast %247 : vector<1x1x8x32xf32> to vector<8x32xf32>
    %c3_155 = arith.constant 3 : index
    %c0_156 = arith.constant 0 : index
    %c0_157 = arith.constant 0 : index
    %249 = vector.load %arg1[%c3_155, %c0_156, %c0_157] : memref<4x32x32xf32, #tpu.memory_space<vmem>>, vector<1x32x32xf32>
    %250 = vector.shape_cast %249 : vector<1x32x32xf32> to vector<32x32xf32>
    %cst_158 = arith.constant dense<0.000000e+00> : vector<8x32xf32>
    %251 = tpu.matmul %209, %250, %cst_158 {dimension_numbers = #tpu.dot_dimension_numbers<[1], [0], [0], [1], [0, 0, 1, 1], [], []>} : vector<8x32xf32>, vector<32x32xf32>, vector<8x32xf32> -> vector<8x32xf32>
    %252 = arith.addf %248, %251 : vector<8x32xf32>
    %253 = arith.negf %252 : vector<8x32xf32>
    %254 = math.exp %253 : vector<8x32xf32>
    %cst_159 = arith.constant 1.000000e+00 : f32
    %255 = vector.broadcast %cst_159 : f32 to vector<8x32xf32>
    %256 = arith.addf %255, %254 : vector<8x32xf32>
    %257 = arith.divf %255, %256 : vector<8x32xf32>
    %258 = arith.mulf %237, %207 : vector<8x32xf32>
    %259 = arith.mulf %225, %245 : vector<8x32xf32>
    %260 = arith.addf %258, %259 : vector<8x32xf32>
    %261 = math.tanh %260 : vector<8x32xf32>
    %262 = arith.mulf %257, %261 : vector<8x32xf32>
    %263 = arith.index_cast %c4_i32 : i32 to index
    %c0_160 = arith.constant 0 : index
    %c0_161 = arith.constant 0 : index
    %264 = vector.load %arg2[%263, %c0_160, %c0_161] : memref<8x8x32xf32, #tpu.memory_space<vmem>>, vector<1x8x32xf32>
    %265 = vector.shape_cast %264 : vector<1x8x32xf32> to vector<8x32xf32>
    %266 = vector.shape_cast %262 : vector<8x32xf32> to vector<1x8x32xf32>
    tpu.vector_store %arg2[%263, %c0_160, %c0_161], %266 {strides = array<i32>} : memref<8x8x32xf32, #tpu.memory_space<vmem>>, vector<1x8x32xf32>,
    %c5_i32 = arith.constant 5 : i32
    %c0_162 = arith.constant 0 : index
    %267 = arith.index_cast %c5_i32 : i32 to index
    %c0_163 = arith.constant 0 : index
    %c0_164 = arith.constant 0 : index
    %268 = vector.load %arg0[%c0_162, %267, %c0_163, %c0_164] : memref<4x8x8x32xf32, #tpu.memory_space<vmem>>, vector<1x1x8x32xf32>
    %269 = vector.shape_cast %268 : vector<1x1x8x32xf32> to vector<8x32xf32>
    %c0_165 = arith.constant 0 : index
    %c0_166 = arith.constant 0 : index
    %c0_167 = arith.constant 0 : index
    %270 = vector.load %arg1[%c0_165, %c0_166, %c0_167] : memref<4x32x32xf32, #tpu.memory_space<vmem>>, vector<1x32x32xf32>
    %271 = vector.shape_cast %270 : vector<1x32x32xf32> to vector<32x32xf32>
    %cst_168 = arith.constant dense<0.000000e+00> : vector<8x32xf32>
    %272 = tpu.matmul %262, %271, %cst_168 {dimension_numbers = #tpu.dot_dimension_numbers<[1], [0], [0], [1], [0, 0, 1, 1], [], []>} : vector<8x32xf32>, vector<32x32xf32>, vector<8x32xf32> -> vector<8x32xf32>
    %273 = arith.addf %269, %272 : vector<8x32xf32>
    %274 = arith.negf %273 : vector<8x32xf32>
    %275 = math.exp %274 : vector<8x32xf32>
    %cst_169 = arith.constant 1.000000e+00 : f32
    %276 = vector.broadcast %cst_169 : f32 to vector<8x32xf32>
    %277 = arith.addf %276, %275 : vector<8x32xf32>
    %278 = arith.divf %276, %277 : vector<8x32xf32>
    %c1_170 = arith.constant 1 : index
    %279 = arith.index_cast %c5_i32 : i32 to index
    %c0_171 = arith.constant 0 : index
    %c0_172 = arith.constant 0 : index
    %280 = vector.load %arg0[%c1_170, %279, %c0_171, %c0_172] : memref<4x8x8x32xf32, #tpu.memory_space<vmem>>, vector<1x1x8x32xf32>
    %281 = vector.shape_cast %280 : vector<1x1x8x32xf32> to vector<8x32xf32>
    %c1_173 = arith.constant 1 : index
    %c0_174 = arith.constant 0 : index
    %c0_175 = arith.constant 0 : index
    %282 = vector.load %arg1[%c1_173, %c0_174, %c0_175] : memref<4x32x32xf32, #tpu.memory_space<vmem>>, vector<1x32x32xf32>
    %283 = vector.shape_cast %282 : vector<1x32x32xf32> to vector<32x32xf32>
    %cst_176 = arith.constant dense<0.000000e+00> : vector<8x32xf32>
    %284 = tpu.matmul %262, %283, %cst_176 {dimension_numbers = #tpu.dot_dimension_numbers<[1], [0], [0], [1], [0, 0, 1, 1], [], []>} : vector<8x32xf32>, vector<32x32xf32>, vector<8x32xf32> -> vector<8x32xf32>
    %285 = arith.addf %281, %284 : vector<8x32xf32>
    %286 = arith.negf %285 : vector<8x32xf32>
    %287 = math.exp %286 : vector<8x32xf32>
    %cst_177 = arith.constant 1.000000e+00 : f32
    %288 = vector.broadcast %cst_177 : f32 to vector<8x32xf32>
    %289 = arith.addf %288, %287 : vector<8x32xf32>
    %290 = arith.divf %288, %289 : vector<8x32xf32>
    %c2_178 = arith.constant 2 : index
    %291 = arith.index_cast %c5_i32 : i32 to index
    %c0_179 = arith.constant 0 : index
    %c0_180 = arith.constant 0 : index
    %292 = vector.load %arg0[%c2_178, %291, %c0_179, %c0_180] : memref<4x8x8x32xf32, #tpu.memory_space<vmem>>, vector<1x1x8x32xf32>
    %293 = vector.shape_cast %292 : vector<1x1x8x32xf32> to vector<8x32xf32>
    %c2_181 = arith.constant 2 : index
    %c0_182 = arith.constant 0 : index
    %c0_183 = arith.constant 0 : index
    %294 = vector.load %arg1[%c2_181, %c0_182, %c0_183] : memref<4x32x32xf32, #tpu.memory_space<vmem>>, vector<1x32x32xf32>
    %295 = vector.shape_cast %294 : vector<1x32x32xf32> to vector<32x32xf32>
    %cst_184 = arith.constant dense<0.000000e+00> : vector<8x32xf32>
    %296 = tpu.matmul %262, %295, %cst_184 {dimension_numbers = #tpu.dot_dimension_numbers<[1], [0], [0], [1], [0, 0, 1, 1], [], []>} : vector<8x32xf32>, vector<32x32xf32>, vector<8x32xf32> -> vector<8x32xf32>
    %297 = arith.addf %293, %296 : vector<8x32xf32>
    %298 = math.tanh %297 : vector<8x32xf32>
    %c3_185 = arith.constant 3 : index
    %299 = arith.index_cast %c5_i32 : i32 to index
    %c0_186 = arith.constant 0 : index
    %c0_187 = arith.constant 0 : index
    %300 = vector.load %arg0[%c3_185, %299, %c0_186, %c0_187] : memref<4x8x8x32xf32, #tpu.memory_space<vmem>>, vector<1x1x8x32xf32>
    %301 = vector.shape_cast %300 : vector<1x1x8x32xf32> to vector<8x32xf32>
    %c3_188 = arith.constant 3 : index
    %c0_189 = arith.constant 0 : index
    %c0_190 = arith.constant 0 : index
    %302 = vector.load %arg1[%c3_188, %c0_189, %c0_190] : memref<4x32x32xf32, #tpu.memory_space<vmem>>, vector<1x32x32xf32>
    %303 = vector.shape_cast %302 : vector<1x32x32xf32> to vector<32x32xf32>
    %cst_191 = arith.constant dense<0.000000e+00> : vector<8x32xf32>
    %304 = tpu.matmul %262, %303, %cst_191 {dimension_numbers = #tpu.dot_dimension_numbers<[1], [0], [0], [1], [0, 0, 1, 1], [], []>} : vector<8x32xf32>, vector<32x32xf32>, vector<8x32xf32> -> vector<8x32xf32>
    %305 = arith.addf %301, %304 : vector<8x32xf32>
    %306 = arith.negf %305 : vector<8x32xf32>
    %307 = math.exp %306 : vector<8x32xf32>
    %cst_192 = arith.constant 1.000000e+00 : f32
    %308 = vector.broadcast %cst_192 : f32 to vector<8x32xf32>
    %309 = arith.addf %308, %307 : vector<8x32xf32>
    %310 = arith.divf %308, %309 : vector<8x32xf32>
    %311 = arith.mulf %290, %260 : vector<8x32xf32>
    %312 = arith.mulf %278, %298 : vector<8x32xf32>
    %313 = arith.addf %311, %312 : vector<8x32xf32>
    %314 = math.tanh %313 : vector<8x32xf32>
    %315 = arith.mulf %310, %314 : vector<8x32xf32>
    %316 = arith.index_cast %c5_i32 : i32 to index
    %c0_193 = arith.constant 0 : index
    %c0_194 = arith.constant 0 : index
    %317 = vector.load %arg2[%316, %c0_193, %c0_194] : memref<8x8x32xf32, #tpu.memory_space<vmem>>, vector<1x8x32xf32>
    %318 = vector.shape_cast %317 : vector<1x8x32xf32> to vector<8x32xf32>
    %319 = vector.shape_cast %315 : vector<8x32xf32> to vector<1x8x32xf32>
    tpu.vector_store %arg2[%316, %c0_193, %c0_194], %319 {strides = array<i32>} : memref<8x8x32xf32, #tpu.memory_space<vmem>>, vector<1x8x32xf32>,
    %c6_i32 = arith.constant 6 : i32
    %c0_195 = arith.constant 0 : index
    %320 = arith.index_cast %c6_i32 : i32 to index
    %c0_196 = arith.constant 0 : index
    %c0_197 = arith.constant 0 : index
    %321 = vector.load %arg0[%c0_195, %320, %c0_196, %c0_197] : memref<4x8x8x32xf32, #tpu.memory_space<vmem>>, vector<1x1x8x32xf32>
    %322 = vector.shape_cast %321 : vector<1x1x8x32xf32> to vector<8x32xf32>
    %c0_198 = arith.constant 0 : index
    %c0_199 = arith.constant 0 : index
    %c0_200 = arith.constant 0 : index
    %323 = vector.load %arg1[%c0_198, %c0_199, %c0_200] : memref<4x32x32xf32, #tpu.memory_space<vmem>>, vector<1x32x32xf32>
    %324 = vector.shape_cast %323 : vector<1x32x32xf32> to vector<32x32xf32>
    %cst_201 = arith.constant dense<0.000000e+00> : vector<8x32xf32>
    %325 = tpu.matmul %315, %324, %cst_201 {dimension_numbers = #tpu.dot_dimension_numbers<[1], [0], [0], [1], [0, 0, 1, 1], [], []>} : vector<8x32xf32>, vector<32x32xf32>, vector<8x32xf32> -> vector<8x32xf32>
    %326 = arith.addf %322, %325 : vector<8x32xf32>
    %327 = arith.negf %326 : vector<8x32xf32>
    %328 = math.exp %327 : vector<8x32xf32>
    %cst_202 = arith.constant 1.000000e+00 : f32
    %329 = vector.broadcast %cst_202 : f32 to vector<8x32xf32>
    %330 = arith.addf %329, %328 : vector<8x32xf32>
    %331 = arith.divf %329, %330 : vector<8x32xf32>
    %c1_203 = arith.constant 1 : index
    %332 = arith.index_cast %c6_i32 : i32 to index
    %c0_204 = arith.constant 0 : index
    %c0_205 = arith.constant 0 : index
    %333 = vector.load %arg0[%c1_203, %332, %c0_204, %c0_205] : memref<4x8x8x32xf32, #tpu.memory_space<vmem>>, vector<1x1x8x32xf32>
    %334 = vector.shape_cast %333 : vector<1x1x8x32xf32> to vector<8x32xf32>
    %c1_206 = arith.constant 1 : index
    %c0_207 = arith.constant 0 : index
    %c0_208 = arith.constant 0 : index
    %335 = vector.load %arg1[%c1_206, %c0_207, %c0_208] : memref<4x32x32xf32, #tpu.memory_space<vmem>>, vector<1x32x32xf32>
    %336 = vector.shape_cast %335 : vector<1x32x32xf32> to vector<32x32xf32>
    %cst_209 = arith.constant dense<0.000000e+00> : vector<8x32xf32>
    %337 = tpu.matmul %315, %336, %cst_209 {dimension_numbers = #tpu.dot_dimension_numbers<[1], [0], [0], [1], [0, 0, 1, 1], [], []>} : vector<8x32xf32>, vector<32x32xf32>, vector<8x32xf32> -> vector<8x32xf32>
    %338 = arith.addf %334, %337 : vector<8x32xf32>
    %339 = arith.negf %338 : vector<8x32xf32>
    %340 = math.exp %339 : vector<8x32xf32>
    %cst_210 = arith.constant 1.000000e+00 : f32
    %341 = vector.broadcast %cst_210 : f32 to vector<8x32xf32>
    %342 = arith.addf %341, %340 : vector<8x32xf32>
    %343 = arith.divf %341, %342 : vector<8x32xf32>
    %c2_211 = arith.constant 2 : index
    %344 = arith.index_cast %c6_i32 : i32 to index
    %c0_212 = arith.constant 0 : index
    %c0_213 = arith.constant 0 : index
    %345 = vector.load %arg0[%c2_211, %344, %c0_212, %c0_213] : memref<4x8x8x32xf32, #tpu.memory_space<vmem>>, vector<1x1x8x32xf32>
    %346 = vector.shape_cast %345 : vector<1x1x8x32xf32> to vector<8x32xf32>
    %c2_214 = arith.constant 2 : index
    %c0_215 = arith.constant 0 : index
    %c0_216 = arith.constant 0 : index
    %347 = vector.load %arg1[%c2_214, %c0_215, %c0_216] : memref<4x32x32xf32, #tpu.memory_space<vmem>>, vector<1x32x32xf32>
    %348 = vector.shape_cast %347 : vector<1x32x32xf32> to vector<32x32xf32>
    %cst_217 = arith.constant dense<0.000000e+00> : vector<8x32xf32>
    %349 = tpu.matmul %315, %348, %cst_217 {dimension_numbers = #tpu.dot_dimension_numbers<[1], [0], [0], [1], [0, 0, 1, 1], [], []>} : vector<8x32xf32>, vector<32x32xf32>, vector<8x32xf32> -> vector<8x32xf32>
    %350 = arith.addf %346, %349 : vector<8x32xf32>
    %351 = math.tanh %350 : vector<8x32xf32>
    %c3_218 = arith.constant 3 : index
    %352 = arith.index_cast %c6_i32 : i32 to index
    %c0_219 = arith.constant 0 : index
    %c0_220 = arith.constant 0 : index
    %353 = vector.load %arg0[%c3_218, %352, %c0_219, %c0_220] : memref<4x8x8x32xf32, #tpu.memory_space<vmem>>, vector<1x1x8x32xf32>
    %354 = vector.shape_cast %353 : vector<1x1x8x32xf32> to vector<8x32xf32>
    %c3_221 = arith.constant 3 : index
    %c0_222 = arith.constant 0 : index
    %c0_223 = arith.constant 0 : index
    %355 = vector.load %arg1[%c3_221, %c0_222, %c0_223] : memref<4x32x32xf32, #tpu.memory_space<vmem>>, vector<1x32x32xf32>
    %356 = vector.shape_cast %355 : vector<1x32x32xf32> to vector<32x32xf32>
    %cst_224 = arith.constant dense<0.000000e+00> : vector<8x32xf32>
    %357 = tpu.matmul %315, %356, %cst_224 {dimension_numbers = #tpu.dot_dimension_numbers<[1], [0], [0], [1], [0, 0, 1, 1], [], []>} : vector<8x32xf32>, vector<32x32xf32>, vector<8x32xf32> -> vector<8x32xf32>
    %358 = arith.addf %354, %357 : vector<8x32xf32>
    %359 = arith.negf %358 : vector<8x32xf32>
    %360 = math.exp %359 : vector<8x32xf32>
    %cst_225 = arith.constant 1.000000e+00 : f32
    %361 = vector.broadcast %cst_225 : f32 to vector<8x32xf32>
    %362 = arith.addf %361, %360 : vector<8x32xf32>
    %363 = arith.divf %361, %362 : vector<8x32xf32>
    %364 = arith.mulf %343, %313 : vector<8x32xf32>
    %365 = arith.mulf %331, %351 : vector<8x32xf32>
    %366 = arith.addf %364, %365 : vector<8x32xf32>
    %367 = math.tanh %366 : vector<8x32xf32>
    %368 = arith.mulf %363, %367 : vector<8x32xf32>
    %369 = arith.index_cast %c6_i32 : i32 to index
    %c0_226 = arith.constant 0 : index
    %c0_227 = arith.constant 0 : index
    %370 = vector.load %arg2[%369, %c0_226, %c0_227] : memref<8x8x32xf32, #tpu.memory_space<vmem>>, vector<1x8x32xf32>
    %371 = vector.shape_cast %370 : vector<1x8x32xf32> to vector<8x32xf32>
    %372 = vector.shape_cast %368 : vector<8x32xf32> to vector<1x8x32xf32>
    tpu.vector_store %arg2[%369, %c0_226, %c0_227], %372 {strides = array<i32>} : memref<8x8x32xf32, #tpu.memory_space<vmem>>, vector<1x8x32xf32>,
    %c7_i32 = arith.constant 7 : i32
    %c0_228 = arith.constant 0 : index
    %373 = arith.index_cast %c7_i32 : i32 to index
    %c0_229 = arith.constant 0 : index
    %c0_230 = arith.constant 0 : index
    %374 = vector.load %arg0[%c0_228, %373, %c0_229, %c0_230] : memref<4x8x8x32xf32, #tpu.memory_space<vmem>>, vector<1x1x8x32xf32>
    %375 = vector.shape_cast %374 : vector<1x1x8x32xf32> to vector<8x32xf32>
    %c0_231 = arith.constant 0 : index
    %c0_232 = arith.constant 0 : index
    %c0_233 = arith.constant 0 : index
    %376 = vector.load %arg1[%c0_231, %c0_232, %c0_233] : memref<4x32x32xf32, #tpu.memory_space<vmem>>, vector<1x32x32xf32>
    %377 = vector.shape_cast %376 : vector<1x32x32xf32> to vector<32x32xf32>
    %cst_234 = arith.constant dense<0.000000e+00> : vector<8x32xf32>
    %378 = tpu.matmul %368, %377, %cst_234 {dimension_numbers = #tpu.dot_dimension_numbers<[1], [0], [0], [1], [0, 0, 1, 1], [], []>} : vector<8x32xf32>, vector<32x32xf32>, vector<8x32xf32> -> vector<8x32xf32>
    %379 = arith.addf %375, %378 : vector<8x32xf32>
    %380 = arith.negf %379 : vector<8x32xf32>
    %381 = math.exp %380 : vector<8x32xf32>
    %cst_235 = arith.constant 1.000000e+00 : f32
    %382 = vector.broadcast %cst_235 : f32 to vector<8x32xf32>
    %383 = arith.addf %382, %381 : vector<8x32xf32>
    %384 = arith.divf %382, %383 : vector<8x32xf32>
    %c1_236 = arith.constant 1 : index
    %385 = arith.index_cast %c7_i32 : i32 to index
    %c0_237 = arith.constant 0 : index
    %c0_238 = arith.constant 0 : index
    %386 = vector.load %arg0[%c1_236, %385, %c0_237, %c0_238] : memref<4x8x8x32xf32, #tpu.memory_space<vmem>>, vector<1x1x8x32xf32>
    %387 = vector.shape_cast %386 : vector<1x1x8x32xf32> to vector<8x32xf32>
    %c1_239 = arith.constant 1 : index
    %c0_240 = arith.constant 0 : index
    %c0_241 = arith.constant 0 : index
    %388 = vector.load %arg1[%c1_239, %c0_240, %c0_241] : memref<4x32x32xf32, #tpu.memory_space<vmem>>, vector<1x32x32xf32>
    %389 = vector.shape_cast %388 : vector<1x32x32xf32> to vector<32x32xf32>
    %cst_242 = arith.constant dense<0.000000e+00> : vector<8x32xf32>
    %390 = tpu.matmul %368, %389, %cst_242 {dimension_numbers = #tpu.dot_dimension_numbers<[1], [0], [0], [1], [0, 0, 1, 1], [], []>} : vector<8x32xf32>, vector<32x32xf32>, vector<8x32xf32> -> vector<8x32xf32>
    %391 = arith.addf %387, %390 : vector<8x32xf32>
    %392 = arith.negf %391 : vector<8x32xf32>
    %393 = math.exp %392 : vector<8x32xf32>
    %cst_243 = arith.constant 1.000000e+00 : f32
    %394 = vector.broadcast %cst_243 : f32 to vector<8x32xf32>
    %395 = arith.addf %394, %393 : vector<8x32xf32>
    %396 = arith.divf %394, %395 : vector<8x32xf32>
    %c2_244 = arith.constant 2 : index
    %397 = arith.index_cast %c7_i32 : i32 to index
    %c0_245 = arith.constant 0 : index
    %c0_246 = arith.constant 0 : index
    %398 = vector.load %arg0[%c2_244, %397, %c0_245, %c0_246] : memref<4x8x8x32xf32, #tpu.memory_space<vmem>>, vector<1x1x8x32xf32>
    %399 = vector.shape_cast %398 : vector<1x1x8x32xf32> to vector<8x32xf32>
    %c2_247 = arith.constant 2 : index
    %c0_248 = arith.constant 0 : index
    %c0_249 = arith.constant 0 : index
    %400 = vector.load %arg1[%c2_247, %c0_248, %c0_249] : memref<4x32x32xf32, #tpu.memory_space<vmem>>, vector<1x32x32xf32>
    %401 = vector.shape_cast %400 : vector<1x32x32xf32> to vector<32x32xf32>
    %cst_250 = arith.constant dense<0.000000e+00> : vector<8x32xf32>
    %402 = tpu.matmul %368, %401, %cst_250 {dimension_numbers = #tpu.dot_dimension_numbers<[1], [0], [0], [1], [0, 0, 1, 1], [], []>} : vector<8x32xf32>, vector<32x32xf32>, vector<8x32xf32> -> vector<8x32xf32>
    %403 = arith.addf %399, %402 : vector<8x32xf32>
    %404 = math.tanh %403 : vector<8x32xf32>
    %c3_251 = arith.constant 3 : index
    %405 = arith.index_cast %c7_i32 : i32 to index
    %c0_252 = arith.constant 0 : index
    %c0_253 = arith.constant 0 : index
    %406 = vector.load %arg0[%c3_251, %405, %c0_252, %c0_253] : memref<4x8x8x32xf32, #tpu.memory_space<vmem>>, vector<1x1x8x32xf32>
    %407 = vector.shape_cast %406 : vector<1x1x8x32xf32> to vector<8x32xf32>
    %c3_254 = arith.constant 3 : index
    %c0_255 = arith.constant 0 : index
    %c0_256 = arith.constant 0 : index
    %408 = vector.load %arg1[%c3_254, %c0_255, %c0_256] : memref<4x32x32xf32, #tpu.memory_space<vmem>>, vector<1x32x32xf32>
    %409 = vector.shape_cast %408 : vector<1x32x32xf32> to vector<32x32xf32>
    %cst_257 = arith.constant dense<0.000000e+00> : vector<8x32xf32>
    %410 = tpu.matmul %368, %409, %cst_257 {dimension_numbers = #tpu.dot_dimension_numbers<[1], [0], [0], [1], [0, 0, 1, 1], [], []>} : vector<8x32xf32>, vector<32x32xf32>, vector<8x32xf32> -> vector<8x32xf32>
    %411 = arith.addf %407, %410 : vector<8x32xf32>
    %412 = arith.negf %411 : vector<8x32xf32>
    %413 = math.exp %412 : vector<8x32xf32>
    %cst_258 = arith.constant 1.000000e+00 : f32
    %414 = vector.broadcast %cst_258 : f32 to vector<8x32xf32>
    %415 = arith.addf %414, %413 : vector<8x32xf32>
    %416 = arith.divf %414, %415 : vector<8x32xf32>
    %417 = arith.mulf %396, %366 : vector<8x32xf32>
    %418 = arith.mulf %384, %404 : vector<8x32xf32>
    %419 = arith.addf %417, %418 : vector<8x32xf32>
    %420 = math.tanh %419 : vector<8x32xf32>
    %421 = arith.mulf %416, %420 : vector<8x32xf32>
    %422 = arith.index_cast %c7_i32 : i32 to index
    %c0_259 = arith.constant 0 : index
    %c0_260 = arith.constant 0 : index
    %423 = vector.load %arg2[%422, %c0_259, %c0_260] : memref<8x8x32xf32, #tpu.memory_space<vmem>>, vector<1x8x32xf32>
    %424 = vector.shape_cast %423 : vector<1x8x32xf32> to vector<8x32xf32>
    %425 = vector.shape_cast %421 : vector<8x32xf32> to vector<1x8x32xf32>
    tpu.vector_store %arg2[%422, %c0_259, %c0_260], %425 {strides = array<i32>} : memref<8x8x32xf32, #tpu.memory_space<vmem>>, vector<1x8x32xf32>,
    %c8_i32 = arith.constant 8 : i32
    return
  }
}

</mosaic_0001>

<bundles_post_ra>
// kernel: decoder_rnn_forward.3
= control target key start
LH: loop header
LB: loop body
LE: loop exit
PB: predicated region body
PF: predicated region fallthrough
CT: control target
= control target key end

     0   :  { %vm33_vm0 = vcmask 261120   ;;  %s319_s1 = inlined_call_operand.vmem [shape: f32[32,128], index: 1, kind: input, shape index: {}]   ;;  %s320_s0 = inlined_call_operand.vmem [shape: f32[64,32], index: 0, kind: input, shape index: {}]   ;;  %s321_s2 = inlined_call_operand.vmem [shape: f32[1,128], index: 2, kind: input, shape index: {}]   ;;  %s322_s3 = inlined_call_operand.vmem [shape: f32[64,128], index: 3, kind: output, shape index: {}]  }
   0x1   :  { %v22_v0 = vld [vmem:[%s319_s1] sm:$0xff]  ;;  %v23_v1 = vld [vmem:[%s319_s1 + $0x8] sm:$0xff]  ;;  %v24_v2 = vld [vmem:[%s319_s1 + $0x10] sm:$0xff] }
   0x2   :  { %v216_v3 = vpack.c.bf16 %v23_v1, %v22_v0  ;;  %v25_v4 = vld [vmem:[%s319_s1 + $0x18] sm:$0xff]  ;;  %v14_v5 = vld [vmem:[%s320_s0] sm:$0xff]  ;;  %v15_v8 = vld [vmem:[%s320_s0 + $0x8] sm:$0xff] }
   0x3   :  { %v18_v6 = vld [vmem:[%s320_s0 + $0x20] sm:$0xff]  ;;  %v220_v7 = vpack.c.bf16 %v25_v4, %v24_v2  ;;  %204 = vmatprep.mubr.msk.f32.mxu0 %vm33_vm0, %v14_v5  ;;  %v19_v9 = vld [vmem:[%s320_s0 + $0x28] sm:$0xff]  ;;  %v16_v10 = vld [vmem:[%s320_s0 + $0x10] sm:$0xff] }
   0x4   :  { %210 = vmatprep.mubr.msk.f32.mxu1 %vm33_vm0, %v18_v6  ;;  %217 = vmatprep.subr.bf16.mxu0 %v216_v3  ;;  %v20_v11 = vld [vmem:[%s320_s0 + $0x30] sm:$0xff]  ;;  %v17_v12 = vld [vmem:[%s320_s0 + $0x18] sm:$0xff]  ;;  %v175_v14 = vld [vmem:[%s321_s2] ss:$0 sm:$0xff] }
   0x5   :  { %224 = vmatprep.subr.bf16.mxu1 %v216_v3  ;;  %219 = vmatpush3.bf16.msra.mxu0 %v216_v3  ;;  %v21_v13 = vld [vmem:[%s320_s0 + $0x38] sm:$0xff] }
   0x6   :  { %226 = vmatpush3.bf16.msra.mxu1 %v216_v3  ;;  %221 = vmatprep.subr.bf16.mxu0 %v220_v7 }
   0x7   :  { %225 = vmatprep.subr.bf16.mxu1 %v220_v7 }
   0x9   :  { %223 = vmatpush3.bf16.msra.mxu0 %v220_v7 }
   0xa   :  { %227 = vmatpush3.bf16.msra.mxu1 %v220_v7 }
   0xc   :  { %205 = vmatmul.mubr.msk.f32.vlgmr.msra.gmra.mrb[0].mxu0 %vm33_vm0, %v15_v8 }
   0xd   :  { %211 = vmatmul.mubr.msk.f32.vlgmr.msra.gmra.mrb[0].mxu1 %vm33_vm0, %v19_v9  ;;  %207 = vmatprep.mubr.msk.f32.mxu0 %vm33_vm0, %v16_v10 }
   0xe   :  { %213 = vmatprep.mubr.msk.f32.mxu1 %vm33_vm0, %v20_v11 }
  0x10   :  { %208 = vmatmul.mubr.msk.f32.gmra.mrb[2].mxu0 %vm33_vm0, %v17_v12 }
  0x11   :  { %214 = vmatmul.mubr.msk.f32.gmra.mrb[2].mxu1 %vm33_vm0, %v21_v13 }
  0xdf   :  { %v206_v15 = vpop.f32.mrb[0].mxu0 }
  0xe0   :  { %v212_v16 = vpop.f32.mrb[0].mxu1  ;;  %v130_v17 = vadd.f32 %v206_v15, %v175_v14  ;;  %v124_v19 = vpop.f32.mrb[1].mxu0 }
  0xe1   :  { %v150_v18 = vadd.f32 %v212_v16, %v175_v14  ;;  %v144_v20 = vpop.f32.mrb[1].mxu1  ;;  %v125_v21 = vadd.f32 %v175_v14, %v124_v19 }
  0xe2   :  { %v145_v22 = vadd.f32 %v175_v14, %v144_v20  ;;  %164 = vst [vmem:[%s322_s3 + $0x8] sm:$0xff] %v130_v17 }
  0xe3   :  { %168 = vst [vmem:[%s322_s3 + $0x28] sm:$0xff] %v150_v18  ;;  %163 = vst [vmem:[%s322_s3] sm:$0xff] %v125_v21  ;;  %v209_v23 = vpop.f32.mrb[2].mxu0 }
  0xe4   :  { %167 = vst [vmem:[%s322_s3 + $0x20] sm:$0xff] %v145_v22  ;;  %v215_v24 = vpop.f32.mrb[2].mxu1  ;;  %v140_v25 = vadd.f32 %v209_v23, %v175_v14  ;;  %v134_v27 = vpop.f32.mrb[3].mxu0 }
  0xe5   :  { %v160_v26 = vadd.f32 %v215_v24, %v175_v14  ;;  %v154_v28 = vpop.f32.mrb[3].mxu1  ;;  %v135_v29 = vadd.f32 %v175_v14, %v134_v27 }
  0xe6   :  { %v155_v30 = vadd.f32 %v175_v14, %v154_v28  ;;  %166 = vst [vmem:[%s322_s3 + $0x18] sm:$0xff] %v140_v25 }
  0xe7   :  { %170 = vst [vmem:[%s322_s3 + $0x38] sm:$0xff] %v160_v26  ;;  %165 = vst [vmem:[%s322_s3 + $0x10] sm:$0xff] %v135_v29 }
  0xe8   :  { %169 = vst [vmem:[%s322_s3 + $0x30] sm:$0xff] %v155_v30 }

// kernel: decoder_rnn_forward.4
= control target key start
LH: loop header
LB: loop body
LE: loop exit
PB: predicated region body
PF: predicated region fallthrough
CT: control target
= control target key end

     0   :  { %v3734_v0 = vmov 0.0|0.0   ;;  %vm3735_vm0 = vmmov 0   ;;  %v3736_v8 = vmov 0.0   ;;  %vm16_vm1 = vcmask 261120   ;;  %s4236_s1 = inlined_call_operand.vmem [shape: f32[4,32,32], index: 1, kind: input, shape index: {}]   ;;  %s4237_s0 = inlined_call_operand.vmem [shape: f32[4,8,8,32], index: 0, kind: input, shape index: {}]   ;;  %s4238_s2 = inlined_call_operand.vmem [shape: f32[8,8,32], index: 2, kind: output, shape index: {}]  }
   0x1   :  { %3411 = vmatprep.subr.bf16.mxu0 %v3734_v0  ;;  %3417 = vmatprep.subr.bf16.mxu1 %v3734_v0  ;;  %v12_v1 = vld [vmem:[%s4236_s1] sm:$0xff]  ;;  %v13_v2 = vld [vmem:[%s4236_s1 + $0x8] sm:$0xff]  ;;  %v14_v6 = vld [vmem:[%s4236_s1 + $0x10] sm:$0xff] }
   0x2   :  { %v2715_v3 = vld [vmem:[%s4236_s1 + $0x20] sm:$0xff]  ;;  %v3763_v4 = vpack.c.bf16 %v13_v2, %v12_v1  ;;  %v2716_v5 = vld [vmem:[%s4236_s1 + $0x28] sm:$0xff]  ;;  %v15_v7 = vld [vmem:[%s4236_s1 + $0x18] sm:$0xff]  ;;  %3067 = vmatprep.mubr.msk.f32.mxu0 %vm3735_vm0, %v3736_v8  ;;  %3078 = vmatprep.mubr.msk.f32.mxu1 %vm3735_vm0, %v3736_v8 }
   0x3   :  { %v3778_v9 = vpack.c.bf16 %v2716_v5, %v2715_v3  ;;  %v2717_v10 = vld [vmem:[%s4236_s1 + $0x30] sm:$0xff]  ;;  %v2718_v11 = vld [vmem:[%s4236_s1 + $0x38] sm:$0xff]  ;;  %v3787_v12 = vpack.c.bf16 %v15_v7, %v14_v6  ;;  %v2721_v14 = vld [vmem:[%s4236_s1 + $0x40] sm:$0xff] }
   0x4   :  { %3413 = vmatpush3.bf16.msra.mxu0 %v3763_v4  ;;  %v3791_v13 = vpack.c.bf16 %v2718_v11, %v2717_v10  ;;  %v2722_v15 = vld [vmem:[%s4236_s1 + $0x48] sm:$0xff]  ;;  %v2726_v16 = vld [vmem:[%s4236_s1 + $0x60] sm:$0xff]  ;;  %v2723_v20 = vld [vmem:[%s4236_s1 + $0x50] sm:$0xff] }
   0x5   :  { %3419 = vmatpush3.bf16.msra.mxu1 %v3778_v9  ;;  %3414 = vmatprep.subr.bf16.mxu0 %v3734_v0  ;;  %v2727_v17 = vld [vmem:[%s4236_s1 + $0x68] sm:$0xff]  ;;  %v3807_v18 = vpack.c.bf16 %v2722_v15, %v2721_v14  ;;  %v2724_v21 = vld [vmem:[%s4236_s1 + $0x58] sm:$0xff]  ;;  %v2728_v22 = vld [vmem:[%s4236_s1 + $0x70] sm:$0xff] }
   0x6   :  { %3420 = vmatprep.subr.bf16.mxu1 %v3734_v0  ;;  %v3811_v19 = vpack.c.bf16 %v2727_v17, %v2726_v16  ;;  %v2729_v23 = vld [vmem:[%s4236_s1 + $0x78] sm:$0xff]  ;;  %v3829_v24 = vpack.c.bf16 %v2724_v21, %v2723_v20  ;;  %v11_v26 = vld [vmem:[%s4237_s0] sm:$0xff]  ;;  %v2731_v60 = vld [vmem:[%s4237_s0 + $0x8] sm:$0xff] }
   0x7   :  { %v3833_v25 = vpack.c.bf16 %v2729_v23, %v2728_v22  ;;  %v2714_v27 = vld [vmem:[%s4237_s0 + $0x40] sm:$0xff]  ;;  %v2734_v61 = vld [vmem:[%s4237_s0 + $0x48] sm:$0xff] }
   0x8   :  { %3416 = vmatpush3.bf16.msra.mxu0 %v3787_v12  ;;  %v2725_v36 = vld [vmem:[%s4237_s0 + $0xc0] sm:$0xff]  ;;  %v2747_v10 = vld [vmem:[%s4237_s0 + $0xc8] sm:$0xff] }
   0x9   :  { %3422 = vmatpush3.bf16.msra.mxu1 %v3791_v13  ;;  %3423 = vmatprep.subr.bf16.mxu0 %v3734_v0  ;;  %v2720_v38 = vld [vmem:[%s4237_s0 + $0x80] sm:$0xff]  ;;  %v2741_v20 = vld [vmem:[%s4237_s0 + $0x88] sm:$0xff] }
   0xa   :  { %3429 = vmatprep.subr.bf16.mxu1 %v3734_v0 }
   0xb   :  { %3068 = vmatmul.mubr.f32.vlgmr.msra.gmra.mrb[0].mxu0 %v3736_v8 }
   0xc   :  { %3079 = vmatmul.mubr.f32.vlgmr.msra.gmra.mrb[0].mxu1 %v3736_v8  ;;  %3425 = vmatpush3.bf16.msra.mxu0 %v3807_v18 }
   0xd   :  { %3431 = vmatpush3.bf16.msra.mxu1 %v3811_v19  ;;  %3426 = vmatprep.subr.bf16.mxu0 %v3734_v0 }
   0xe   :  { %3432 = vmatprep.subr.bf16.mxu1 %v3734_v0  ;;  %3089 = vmatprep.mubr.msk.f32.mxu0 %vm3735_vm0, %v3736_v8 }
   0xf   :  { %3100 = vmatprep.mubr.msk.f32.mxu1 %vm3735_vm0, %v3736_v8 }
  0x10   :  { %3428 = vmatpush3.bf16.msra.mxu0 %v3829_v24 }
  0x11   :  { %3434 = vmatpush3.bf16.msra.mxu1 %v3833_v25  ;;  %3435 = vmatprep.subr.bf16.mxu0 %v3734_v0 }
  0x12   :  { %3441 = vmatprep.subr.bf16.mxu1 %v3734_v0 }
  0x13   :  { %3090 = vmatmul.mubr.f32.vlgmr.msra.gmra.mrb[2].mxu0 %v3736_v8 }
  0x14   :  { %3101 = vmatmul.mubr.f32.vlgmr.msra.gmra.mrb[2].mxu1 %v3736_v8  ;;  %3437 = vmatpush3.bf16.msra.mxu0 %v3763_v4 }
  0x15   :  { %3443 = vmatpush3.bf16.msra.mxu1 %v3778_v9  ;;  %3438 = vmatprep.subr.bf16.mxu0 %v3734_v0 }
  0x16   :  { %3444 = vmatprep.subr.bf16.mxu1 %v3734_v0  ;;  %3111 = vmatprep.mubr.msk.f32.mxu0 %vm3735_vm0, %v3736_v8 }
  0x17   :  { %3122 = vmatprep.mubr.msk.f32.mxu1 %vm3735_vm0, %v3736_v8 }
  0x18   :  { %3440 = vmatpush3.bf16.msra.mxu0 %v3787_v12 }
  0x19   :  { %3446 = vmatpush3.bf16.msra.mxu1 %v3791_v13  ;;  %3447 = vmatprep.subr.bf16.mxu0 %v3734_v0 }
  0x1a   :  { %3453 = vmatprep.subr.bf16.mxu1 %v3734_v0 }
  0xde   :  { %v86_v28 = vpop.f32.mrb[0].mxu0 }
  0xdf   :  { %v90_v29 = vadd.f32 %v86_v28, %v11_v26  ;;  %v170_v30 = vpop.f32.mrb[0].mxu1  ;;  %v3069_v31 = vpop.f32.mrb[1].mxu0 }
  0xe0   :  { %v174_v32 = vadd.f32 %v2714_v27, %v170_v30  ;;  %v3080_v33 = vpop.f32.mrb[1].mxu1 }
  0xe1   :  { %v2713_v34 = vmul.f32 -1.442695, %v90_v29 }
  0xe2   :  { %v2719_v35 = vmul.f32 -1.442695, %v174_v32 }
  0xe3   :  { %3606 = vpow2.f32 %v2713_v34 }
  0xe4   :  { %3608 = vpow2.f32 %v2719_v35 }
  0xe6   :  { %v254_v37 = vpop.f32.mrb[2].mxu0 }
  0xe7   :  { %v333_v39 = vpop.f32.mrb[2].mxu1  ;;  %v3091_v40 = vpop.f32.mrb[3].mxu0  ;;  %v258_v43 = vadd.f32 %v2720_v38, %v254_v37 }
  0xe8   :  { %v337_v41 = vadd.f32 %v2725_v36, %v333_v39  ;;  %v3102_v42 = vpop.f32.mrb[3].mxu1  ;;  %v2755_v40 = vld [vmem:[%s4237_s0 + $0x10] sm:$0xff] }
  0xea   :  { %v2730_v44 = vmul.f32 -1.442695, %v337_v41  ;;  %v2758_v41 = vld [vmem:[%s4237_s0 + $0x50] sm:$0xff] }
  0xec   :  { %3610 = vpow2.f32 %v2730_v44 }
  0xed   :  { %v3607_v45 = vpop.eup %3606  ;;  %3612 = vtanh.f32 %v258_v43 }
  0xee   :  { %v3609_v46 = vpop.eup %3608  ;;  %v94_v47 = vadd.f32 1.0, %v3607_v45 }
  0xef   :  { %v178_v48 = vadd.f32 1.0, %v3609_v46 }
  0xf0   :  { %3614 = vrcp.f32 %v94_v47 }
  0xf1   :  { %3616 = vrcp.f32 %v178_v48 }
  0xf6   :  { %v3611_v49 = vpop.eup %3610 }
  0xf7   :  { %v3613_v50 = vpop.eup %3612  ;;  %v341_v52 = vadd.f32 1.0, %v3611_v49 }
  0xf9   :  { %3618 = vrcp.f32 %v341_v52 }
  0xfa   :  { %v3615_v51 = vpop.eup %3614 }
  0xfb   :  { %v3617_v53 = vpop.eup %3616  ;;  %v345_v54 = vmul.f32 %v3615_v51, %v3613_v50  ;;  %v2771_v50 = vld [vmem:[%s4237_s0 + $0xd0] sm:$0xff] }
  0xfc   :  { %v344_v55 = vmul.f32 0.0, %v3617_v53 }
  0xfe   :  { %v3870_v56 = vadd.f32 %v345_v54, %v344_v55 }
 0x100   :  { %3620 = vtanh.f32 %v3870_v56 }
 0x103   :  { %v3619_v57 = vpop.eup %3618 }
 0x10a   :  { %v3621_v58 = vpop.eup %3620 }
 0x10b   :  { %v348_v59 = vmul.f32 %v3621_v58, %v3619_v57 }
 0x10d   :  { %349 = vst.msk [vmem:[%s4238_s2] sm:$0xff] %vm16_vm1, %v348_v59  ;;  %3112 = vmatmul.mubr.msk.f32.vlgmr.msra.gmra.mrb[4].mxu0 %vm16_vm1, %v348_v59  ;;  %3123 = vmatmul.mubr.msk.f32.vlgmr.msra.gmra.mrb[4].mxu1 %vm16_vm1, %v348_v59 }
 0x10e   :  { %3449 = vmatpush3.bf16.msra.mxu0 %v3807_v18  ;;  %3455 = vmatpush3.bf16.msra.mxu1 %v3811_v19 }
 0x10f   :  { %3450 = vmatprep.subr.bf16.mxu0 %v3734_v0  ;;  %3456 = vmatprep.subr.bf16.mxu1 %v3734_v0 }
 0x110   :  { %3133 = vmatprep.mubr.msk.f32.mxu0 %vm3735_vm0, %v3736_v8  ;;  %3144 = vmatprep.mubr.msk.f32.mxu1 %vm3735_vm0, %v3736_v8 }
 0x112   :  { %3452 = vmatpush3.bf16.msra.mxu0 %v3829_v24  ;;  %3458 = vmatpush3.bf16.msra.mxu1 %v3833_v25 }
 0x113   :  { %3459 = vmatprep.subr.bf16.mxu0 %v3734_v0  ;;  %3465 = vmatprep.subr.bf16.mxu1 %v3734_v0 }
 0x115   :  { %3134 = vmatmul.mubr.msk.f32.vlgmr.msra.gmra.mrb[6].mxu0 %vm16_vm1, %v348_v59  ;;  %3145 = vmatmul.mubr.msk.f32.vlgmr.msra.gmra.mrb[6].mxu1 %vm16_vm1, %v348_v59 }
 0x116   :  { %3461 = vmatpush3.bf16.msra.mxu0 %v3763_v4  ;;  %3467 = vmatpush3.bf16.msra.mxu1 %v3778_v9 }
 0x117   :  { %3462 = vmatprep.subr.bf16.mxu0 %v3734_v0  ;;  %3468 = vmatprep.subr.bf16.mxu1 %v3734_v0 }
 0x118   :  { %3155 = vmatprep.mubr.msk.f32.mxu0 %vm3735_vm0, %v3736_v8  ;;  %3166 = vmatprep.mubr.msk.f32.mxu1 %vm3735_vm0, %v3736_v8 }
 0x11a   :  { %3464 = vmatpush3.bf16.msra.mxu0 %v3787_v12  ;;  %3470 = vmatpush3.bf16.msra.mxu1 %v3791_v13 }
 0x11b   :  { %3471 = vmatprep.subr.bf16.mxu0 %v3734_v0  ;;  %3477 = vmatprep.subr.bf16.mxu1 %v3734_v0 }
 0x1e0   :  { %v425_v62 = vpop.f32.mrb[4].mxu0  ;;  %v508_v63 = vpop.f32.mrb[4].mxu1 }
 0x1e1   :  { %v429_v1 = vadd.f32 %v2731_v60, %v425_v62  ;;  %v512_v2 = vadd.f32 %v2734_v61, %v508_v63  ;;  %v3113_v3 = vpop.f32.mrb[5].mxu0  ;;  %v3124_v5 = vpop.f32.mrb[5].mxu1 }
 0x1e3   :  { %v2733_v6 = vmul.f32 -1.442695, %v429_v1  ;;  %v2740_v7 = vmul.f32 -1.442695, %v512_v2 }
 0x1e5   :  { %3622 = vpow2.f32 %v2733_v6 }
 0x1e6   :  { %3624 = vpow2.f32 %v2740_v7 }
 0x1e8   :  { %v591_v11 = vpop.f32.mrb[6].mxu0  ;;  %v669_v14 = vpop.f32.mrb[6].mxu1 }
 0x1e9   :  { %v673_v15 = vadd.f32 %v2747_v10, %v669_v14  ;;  %v3135_v16 = vpop.f32.mrb[7].mxu0  ;;  %v3146_v17 = vpop.f32.mrb[7].mxu1  ;;  %v595_v22 = vadd.f32 %v2741_v20, %v591_v11 }
 0x1ea   :  { %v2779_v16 = vld [vmem:[%s4237_s0 + $0x18] sm:$0xff] }
 0x1eb   :  { %v2753_v21 = vmul.f32 -1.442695, %v673_v15  ;;  %v2782_v17 = vld [vmem:[%s4237_s0 + $0x58] sm:$0xff] }
 0x1ed   :  { %3626 = vpow2.f32 %v2753_v21 }
 0x1ee   :  { %3628 = vtanh.f32 %v595_v22 }
 0x1ef   :  { %v3623_v23 = vpop.eup %3622 }
 0x1f0   :  { %v3625_v26 = vpop.eup %3624  ;;  %v433_v27 = vadd.f32 1.0, %v3623_v23 }
 0x1f1   :  { %v516_v28 = vadd.f32 1.0, %v3625_v26 }
 0x1f2   :  { %3630 = vrcp.f32 %v433_v27 }
 0x1f3   :  { %3632 = vrcp.f32 %v516_v28 }
 0x1f7   :  { %v3627_v29 = vpop.eup %3626 }
 0x1f8   :  { %v3629_v30 = vpop.eup %3628  ;;  %v677_v34 = vadd.f32 1.0, %v3627_v29 }
 0x1fa   :  { %3634 = vrcp.f32 %v677_v34 }
 0x1fc   :  { %v3631_v31 = vpop.eup %3630 }
 0x1fd   :  { %v3633_v32 = vpop.eup %3632  ;;  %v681_v33 = vmul.f32 %v3631_v31, %v3629_v30  ;;  %v2795_v30 = vld [vmem:[%s4237_s0 + $0xd8] sm:$0xff] }
 0x1fe   :  { %v680_v35 = vmul.f32 %v3633_v32, %v3870_v56  ;;  %v2765_v56 = vld [vmem:[%s4237_s0 + $0x90] sm:$0xff] }
 0x200   :  { %v3918_v36 = vadd.f32 %v681_v33, %v680_v35 }
 0x202   :  { %3636 = vtanh.f32 %v3918_v36 }
 0x204   :  { %v3635_v37 = vpop.eup %3634 }
 0x20c   :  { %v3637_v38 = vpop.eup %3636 }
 0x20d   :  { %v684_v39 = vmul.f32 %v3637_v38, %v3635_v37 }
 0x20f   :  { %2754 = vst.msk [vmem:[%s4238_s2 + $0x8] sm:$0xff] %vm16_vm1, %v684_v39  ;;  %3156 = vmatmul.mubr.msk.f32.vlgmr.msra.gmra.mrb[8].mxu0 %vm16_vm1, %v684_v39  ;;  %3167 = vmatmul.mubr.msk.f32.vlgmr.msra.gmra.mrb[8].mxu1 %vm16_vm1, %v684_v39 }
 0x210   :  { %3473 = vmatpush3.bf16.msra.mxu0 %v3807_v18  ;;  %3479 = vmatpush3.bf16.msra.mxu1 %v3811_v19 }
 0x211   :  { %3474 = vmatprep.subr.bf16.mxu0 %v3734_v0  ;;  %3480 = vmatprep.subr.bf16.mxu1 %v3734_v0 }
 0x212   :  { %3177 = vmatprep.mubr.msk.f32.mxu0 %vm3735_vm0, %v3736_v8  ;;  %3188 = vmatprep.mubr.msk.f32.mxu1 %vm3735_vm0, %v3736_v8 }
 0x214   :  { %3476 = vmatpush3.bf16.msra.mxu0 %v3829_v24  ;;  %3482 = vmatpush3.bf16.msra.mxu1 %v3833_v25 }
 0x215   :  { %3483 = vmatprep.subr.bf16.mxu0 %v3734_v0  ;;  %3489 = vmatprep.subr.bf16.mxu1 %v3734_v0 }
 0x217   :  { %3178 = vmatmul.mubr.msk.f32.vlgmr.msra.gmra.mrb[10].mxu0 %vm16_vm1, %v684_v39  ;;  %3189 = vmatmul.mubr.msk.f32.vlgmr.msra.gmra.mrb[10].mxu1 %vm16_vm1, %v684_v39 }
 0x218   :  { %3485 = vmatpush3.bf16.msra.mxu0 %v3763_v4  ;;  %3491 = vmatpush3.bf16.msra.mxu1 %v3778_v9 }
 0x219   :  { %3486 = vmatprep.subr.bf16.mxu0 %v3734_v0  ;;  %3492 = vmatprep.subr.bf16.mxu1 %v3734_v0 }
 0x21a   :  { %3199 = vmatprep.mubr.msk.f32.mxu0 %vm3735_vm0, %v3736_v8  ;;  %3210 = vmatprep.mubr.msk.f32.mxu1 %vm3735_vm0, %v3736_v8 }
 0x21c   :  { %3488 = vmatpush3.bf16.msra.mxu0 %v3787_v12  ;;  %3494 = vmatpush3.bf16.msra.mxu1 %v3791_v13 }
 0x21d   :  { %3495 = vmatprep.subr.bf16.mxu0 %v3734_v0  ;;  %3501 = vmatprep.subr.bf16.mxu1 %v3734_v0 }
 0x2e2   :  { %v762_v42 = vpop.f32.mrb[8].mxu0  ;;  %v845_v43 = vpop.f32.mrb[8].mxu1 }
 0x2e3   :  { %v766_v44 = vadd.f32 %v2755_v40, %v762_v42  ;;  %v849_v45 = vadd.f32 %v2758_v41, %v845_v43  ;;  %v3157_v46 = vpop.f32.mrb[9].mxu0  ;;  %v3168_v47 = vpop.f32.mrb[9].mxu1 }
 0x2e5   :  { %v2757_v48 = vmul.f32 -1.442695, %v766_v44  ;;  %v2764_v49 = vmul.f32 -1.442695, %v849_v45 }
 0x2e7   :  { %3638 = vpow2.f32 %v2757_v48 }
 0x2e8   :  { %3640 = vpow2.f32 %v2764_v49 }
 0x2ea   :  { %v928_v51 = vpop.f32.mrb[10].mxu0  ;;  %v1006_v52 = vpop.f32.mrb[10].mxu1 }
 0x2eb   :  { %v1010_v53 = vadd.f32 %v2771_v50, %v1006_v52  ;;  %v3179_v54 = vpop.f32.mrb[11].mxu0  ;;  %v3190_v55 = vpop.f32.mrb[11].mxu1  ;;  %v932_v58 = vadd.f32 %v2765_v56, %v928_v51 }
 0x2ec   :  { %v2803_v54 = vld [vmem:[%s4237_s0 + $0x20] sm:$0xff] }
 0x2ed   :  { %v2777_v57 = vmul.f32 -1.442695, %v1010_v53  ;;  %v2806_v55 = vld [vmem:[%s4237_s0 + $0x60] sm:$0xff] }
 0x2ef   :  { %3642 = vpow2.f32 %v2777_v57 }
 0x2f0   :  { %3644 = vtanh.f32 %v932_v58 }
 0x2f1   :  { %v3639_v59 = vpop.eup %3638 }
 0x2f2   :  { %v3641_v60 = vpop.eup %3640  ;;  %v770_v61 = vadd.f32 1.0, %v3639_v59 }
 0x2f3   :  { %v853_v62 = vadd.f32 1.0, %v3641_v60 }
 0x2f4   :  { %3646 = vrcp.f32 %v770_v61 }
 0x2f5   :  { %3648 = vrcp.f32 %v853_v62 }
 0x2f9   :  { %v3643_v63 = vpop.eup %3642 }
 0x2fa   :  { %v3645_v1 = vpop.eup %3644  ;;  %v1014_v6 = vadd.f32 1.0, %v3643_v63 }
 0x2fc   :  { %3650 = vrcp.f32 %v1014_v6 }
 0x2fe   :  { %v3647_v2 = vpop.eup %3646 }
 0x2ff   :  { %v3649_v3 = vpop.eup %3648  ;;  %v1018_v5 = vmul.f32 %v3647_v2, %v3645_v1  ;;  %v2819_v1 = vld [vmem:[%s4237_s0 + $0xe0] sm:$0xff] }
 0x300   :  { %v1017_v7 = vmul.f32 %v3649_v3, %v3918_v36  ;;  %v2789_v36 = vld [vmem:[%s4237_s0 + $0x98] sm:$0xff] }
 0x302   :  { %v3966_v10 = vadd.f32 %v1018_v5, %v1017_v7 }
 0x304   :  { %3652 = vtanh.f32 %v3966_v10 }
 0x306   :  { %v3651_v11 = vpop.eup %3650 }
 0x30e   :  { %v3653_v14 = vpop.eup %3652 }
 0x30f   :  { %v1021_v15 = vmul.f32 %v3653_v14, %v3651_v11 }
 0x311   :  { %2778 = vst.msk [vmem:[%s4238_s2 + $0x10] sm:$0xff] %vm16_vm1, %v1021_v15  ;;  %3200 = vmatmul.mubr.msk.f32.vlgmr.msra.gmra.mrb[12].mxu0 %vm16_vm1, %v1021_v15  ;;  %3211 = vmatmul.mubr.msk.f32.vlgmr.msra.gmra.mrb[12].mxu1 %vm16_vm1, %v1021_v15 }
 0x312   :  { %3497 = vmatpush3.bf16.msra.mxu0 %v3807_v18  ;;  %3503 = vmatpush3.bf16.msra.mxu1 %v3811_v19 }
 0x313   :  { %3498 = vmatprep.subr.bf16.mxu0 %v3734_v0  ;;  %3504 = vmatprep.subr.bf16.mxu1 %v3734_v0 }
 0x314   :  { %3221 = vmatprep.mubr.msk.f32.mxu0 %vm3735_vm0, %v3736_v8  ;;  %3232 = vmatprep.mubr.msk.f32.mxu1 %vm3735_vm0, %v3736_v8 }
 0x316   :  { %3500 = vmatpush3.bf16.msra.mxu0 %v3829_v24  ;;  %3506 = vmatpush3.bf16.msra.mxu1 %v3833_v25 }
 0x317   :  { %3507 = vmatprep.subr.bf16.mxu0 %v3734_v0  ;;  %3513 = vmatprep.subr.bf16.mxu1 %v3734_v0 }
 0x319   :  { %3222 = vmatmul.mubr.msk.f32.vlgmr.msra.gmra.mrb[14].mxu0 %vm16_vm1, %v1021_v15  ;;  %3233 = vmatmul.mubr.msk.f32.vlgmr.msra.gmra.mrb[14].mxu1 %vm16_vm1, %v1021_v15 }
 0x31a   :  { %3509 = vmatpush3.bf16.msra.mxu0 %v3763_v4  ;;  %3515 = vmatpush3.bf16.msra.mxu1 %v3778_v9 }
 0x31b   :  { %3510 = vmatprep.subr.bf16.mxu0 %v3734_v0  ;;  %3516 = vmatprep.subr.bf16.mxu1 %v3734_v0 }
 0x31c   :  { %3243 = vmatprep.mubr.msk.f32.mxu0 %vm3735_vm0, %v3736_v8  ;;  %3254 = vmatprep.mubr.msk.f32.mxu1 %vm3735_vm0, %v3736_v8 }
 0x31e   :  { %3512 = vmatpush3.bf16.msra.mxu0 %v3787_v12  ;;  %3518 = vmatpush3.bf16.msra.mxu1 %v3791_v13 }
 0x31f   :  { %3519 = vmatprep.subr.bf16.mxu0 %v3734_v0  ;;  %3525 = vmatprep.subr.bf16.mxu1 %v3734_v0 }
 0x3e4   :  { %v1099_v20 = vpop.f32.mrb[12].mxu0  ;;  %v1182_v21 = vpop.f32.mrb[12].mxu1 }
 0x3e5   :  { %v1103_v22 = vadd.f32 %v2779_v16, %v1099_v20  ;;  %v1186_v23 = vadd.f32 %v2782_v17, %v1182_v21  ;;  %v3201_v26 = vpop.f32.mrb[13].mxu0  ;;  %v3212_v27 = vpop.f32.mrb[13].mxu1 }
 0x3e7   :  { %v2781_v28 = vmul.f32 -1.442695, %v1103_v22  ;;  %v2788_v29 = vmul.f32 -1.442695, %v1186_v23 }
 0x3e9   :  { %3654 = vpow2.f32 %v2781_v28 }
 0x3ea   :  { %3656 = vpow2.f32 %v2788_v29 }
 0x3ec   :  { %v1265_v31 = vpop.f32.mrb[14].mxu0  ;;  %v1343_v32 = vpop.f32.mrb[14].mxu1 }
 0x3ed   :  { %v1347_v33 = vadd.f32 %v2795_v30, %v1343_v32  ;;  %v3223_v34 = vpop.f32.mrb[15].mxu0  ;;  %v3234_v35 = vpop.f32.mrb[15].mxu1  ;;  %v1269_v38 = vadd.f32 %v2789_v36, %v1265_v31 }
 0x3ef   :  { %v2801_v37 = vmul.f32 -1.442695, %v1347_v33 }
 0x3f1   :  { %3658 = vpow2.f32 %v2801_v37 }
 0x3f2   :  { %3660 = vtanh.f32 %v1269_v38 }
 0x3f3   :  { %v3655_v39 = vpop.eup %3654 }
 0x3f4   :  { %v3657_v40 = vpop.eup %3656  ;;  %v1107_v41 = vadd.f32 1.0, %v3655_v39 }
 0x3f5   :  { %v1190_v42 = vadd.f32 1.0, %v3657_v40  ;;  %v2843_v40 = vld [vmem:[%s4237_s0 + $0xe8] sm:$0xff] }
 0x3f6   :  { %3662 = vrcp.f32 %v1107_v41 }
 0x3f7   :  { %3664 = vrcp.f32 %v1190_v42 }
 0x3fb   :  { %v3659_v43 = vpop.eup %3658 }
 0x3fc   :  { %v3661_v44 = vpop.eup %3660  ;;  %v1351_v48 = vadd.f32 1.0, %v3659_v43 }
 0x3fe   :  { %3666 = vrcp.f32 %v1351_v48 }
 0x400   :  { %v3663_v45 = vpop.eup %3662 }
 0x401   :  { %v3665_v46 = vpop.eup %3664  ;;  %v1355_v47 = vmul.f32 %v3663_v45, %v3661_v44 }
 0x402   :  { %v1354_v49 = vmul.f32 %v3665_v46, %v3966_v10  ;;  %v2813_v10 = vld [vmem:[%s4237_s0 + $0xa0] sm:$0xff]  ;;  %v2837_v46 = vld [vmem:[%s4237_s0 + $0xa8] sm:$0xff] }
 0x404   :  { %v4014_v50 = vadd.f32 %v1355_v47, %v1354_v49 }
 0x406   :  { %3668 = vtanh.f32 %v4014_v50 }
 0x408   :  { %v3667_v51 = vpop.eup %3666 }
 0x410   :  { %v3669_v52 = vpop.eup %3668 }
 0x411   :  { %v1358_v53 = vmul.f32 %v3669_v52, %v3667_v51 }
 0x413   :  { %2802 = vst.msk [vmem:[%s4238_s2 + $0x18] sm:$0xff] %vm16_vm1, %v1358_v53  ;;  %3244 = vmatmul.mubr.msk.f32.vlgmr.msra.gmra.mrb[16].mxu0 %vm16_vm1, %v1358_v53  ;;  %3255 = vmatmul.mubr.msk.f32.vlgmr.msra.gmra.mrb[16].mxu1 %vm16_vm1, %v1358_v53 }
 0x414   :  { %3521 = vmatpush3.bf16.msra.mxu0 %v3807_v18  ;;  %3527 = vmatpush3.bf16.msra.mxu1 %v3811_v19 }
 0x415   :  { %3522 = vmatprep.subr.bf16.mxu0 %v3734_v0  ;;  %3528 = vmatprep.subr.bf16.mxu1 %v3734_v0 }
 0x416   :  { %3265 = vmatprep.mubr.msk.f32.mxu0 %vm3735_vm0, %v3736_v8  ;;  %3276 = vmatprep.mubr.msk.f32.mxu1 %vm3735_vm0, %v3736_v8 }
 0x418   :  { %3524 = vmatpush3.bf16.msra.mxu0 %v3829_v24  ;;  %3530 = vmatpush3.bf16.msra.mxu1 %v3833_v25 }
 0x419   :  { %3531 = vmatprep.subr.bf16.mxu0 %v3734_v0  ;;  %3537 = vmatprep.subr.bf16.mxu1 %v3734_v0 }
 0x41b   :  { %3266 = vmatmul.mubr.msk.f32.vlgmr.msra.gmra.mrb[18].mxu0 %vm16_vm1, %v1358_v53  ;;  %3277 = vmatmul.mubr.msk.f32.vlgmr.msra.gmra.mrb[18].mxu1 %vm16_vm1, %v1358_v53 }
 0x41c   :  { %3533 = vmatpush3.bf16.msra.mxu0 %v3763_v4  ;;  %3539 = vmatpush3.bf16.msra.mxu1 %v3778_v9 }
 0x41d   :  { %3534 = vmatprep.subr.bf16.mxu0 %v3734_v0  ;;  %3540 = vmatprep.subr.bf16.mxu1 %v3734_v0 }
 0x41e   :  { %3287 = vmatprep.mubr.msk.f32.mxu0 %vm3735_vm0, %v3736_v8  ;;  %3298 = vmatprep.mubr.msk.f32.mxu1 %vm3735_vm0, %v3736_v8 }
 0x420   :  { %3536 = vmatpush3.bf16.msra.mxu0 %v3787_v12  ;;  %3542 = vmatpush3.bf16.msra.mxu1 %v3791_v13 }
 0x421   :  { %3543 = vmatprep.subr.bf16.mxu0 %v3734_v0  ;;  %3549 = vmatprep.subr.bf16.mxu1 %v3734_v0 }
 0x4e6   :  { %v1436_v56 = vpop.f32.mrb[16].mxu0  ;;  %v1519_v57 = vpop.f32.mrb[16].mxu1 }
 0x4e7   :  { %v1440_v58 = vadd.f32 %v2803_v54, %v1436_v56  ;;  %v1523_v59 = vadd.f32 %v2806_v55, %v1519_v57  ;;  %v3245_v60 = vpop.f32.mrb[17].mxu0  ;;  %v3256_v61 = vpop.f32.mrb[17].mxu1 }
 0x4e9   :  { %v2805_v62 = vmul.f32 -1.442695, %v1440_v58  ;;  %v2812_v63 = vmul.f32 -1.442695, %v1523_v59 }
 0x4eb   :  { %3670 = vpow2.f32 %v2805_v62 }
 0x4ec   :  { %3672 = vpow2.f32 %v2812_v63 }
 0x4ee   :  { %v1602_v2 = vpop.f32.mrb[18].mxu0  ;;  %v1680_v3 = vpop.f32.mrb[18].mxu1 }
 0x4ef   :  { %v1684_v5 = vadd.f32 %v2819_v1, %v1680_v3  ;;  %v3267_v6 = vpop.f32.mrb[19].mxu0  ;;  %v3278_v7 = vpop.f32.mrb[19].mxu1  ;;  %v1606_v14 = vadd.f32 %v2813_v10, %v1602_v2  ;;  %v2880_v1 = vld [vmem:[%s4236_s1 + $0x28] sm:$0xff]  ;;  %v2376_v2 = vld [vmem:[%s4236_s1 + $0x10] sm:$0xff]  ;;  %v2377_v3 = vld [vmem:[%s4236_s1 + $0x18] sm:$0xff] }
 0x4f0   :  { %v2881_v6 = vld [vmem:[%s4236_s1 + $0x30] sm:$0xff]  ;;  %v2882_v7 = vld [vmem:[%s4236_s1 + $0x38] sm:$0xff]  ;;  %v3583_v10 = vpack.c.bf16 %v2377_v3, %v2376_v2 }
 0x4f1   :  { %v2825_v11 = vmul.f32 -1.442695, %v1684_v5 }
 0x4f3   :  { %3674 = vpow2.f32 %v2825_v11  ;;  %v3589_v11 = vpack.c.bf16 %v2882_v7, %v2881_v6 }
 0x4f4   :  { %3676 = vtanh.f32 %v1606_v14  ;;  %v2851_v14 = vld [vmem:[%s4237_s0 + $0x30] sm:$0xff] }
 0x4f5   :  { %v3671_v15 = vpop.eup %3670 }
 0x4f6   :  { %v3673_v16 = vpop.eup %3672  ;;  %v1444_v17 = vadd.f32 1.0, %v3671_v15  ;;  %v2854_v15 = vld [vmem:[%s4237_s0 + $0x70] sm:$0xff] }
 0x4f7   :  { %v1527_v20 = vadd.f32 1.0, %v3673_v16 }
 0x4f8   :  { %3678 = vrcp.f32 %v1444_v17 }
 0x4f9   :  { %3680 = vrcp.f32 %v1527_v20 }
 0x4fd   :  { %v3675_v21 = vpop.eup %3674 }
 0x4fe   :  { %v3677_v22 = vpop.eup %3676  ;;  %v1688_v28 = vadd.f32 1.0, %v3675_v21 }
 0x500   :  { %3682 = vrcp.f32 %v1688_v28  ;;  %v2867_v28 = vld [vmem:[%s4237_s0 + $0xf0] sm:$0xff] }
 0x502   :  { %v3679_v23 = vpop.eup %3678 }
 0x503   :  { %v3681_v26 = vpop.eup %3680  ;;  %v1692_v27 = vmul.f32 %v3679_v23, %v3677_v22 }
 0x504   :  { %v1691_v29 = vmul.f32 %v3681_v26, %v4014_v50 }
 0x506   :  { %v4062_v30 = vadd.f32 %v1692_v27, %v1691_v29 }
 0x508   :  { %3684 = vtanh.f32 %v4062_v30 }
 0x50a   :  { %v3683_v31 = vpop.eup %3682 }
 0x512   :  { %v3685_v32 = vpop.eup %3684 }
 0x513   :  { %v1695_v33 = vmul.f32 %v3685_v32, %v3683_v31 }
 0x515   :  { %2826 = vst.msk [vmem:[%s4238_s2 + $0x20] sm:$0xff] %vm16_vm1, %v1695_v33  ;;  %3288 = vmatmul.mubr.msk.f32.vlgmr.msra.gmra.mrb[20].mxu0 %vm16_vm1, %v1695_v33  ;;  %3299 = vmatmul.mubr.msk.f32.vlgmr.msra.gmra.mrb[20].mxu1 %vm16_vm1, %v1695_v33 }
 0x516   :  { %3545 = vmatpush3.bf16.msra.mxu0 %v3807_v18  ;;  %3551 = vmatpush3.bf16.msra.mxu1 %v3811_v19 }
 0x517   :  { %3546 = vmatprep.subr.bf16.mxu0 %v3734_v0  ;;  %3552 = vmatprep.subr.bf16.mxu1 %v3734_v0 }
 0x518   :  { %3309 = vmatprep.mubr.msk.f32.mxu0 %vm3735_vm0, %v3736_v8  ;;  %3320 = vmatprep.mubr.msk.f32.mxu1 %vm3735_vm0, %v3736_v8 }
 0x51a   :  { %3548 = vmatpush3.bf16.msra.mxu0 %v3829_v24  ;;  %3554 = vmatpush3.bf16.msra.mxu1 %v3833_v25 }
 0x51b   :  { %3555 = vmatprep.subr.bf16.mxu0 %v3734_v0  ;;  %3561 = vmatprep.subr.bf16.mxu1 %v3734_v0 }
 0x51d   :  { %3310 = vmatmul.mubr.msk.f32.vlgmr.msra.gmra.mrb[22].mxu0 %vm16_vm1, %v1695_v33  ;;  %3321 = vmatmul.mubr.msk.f32.vlgmr.msra.gmra.mrb[22].mxu1 %vm16_vm1, %v1695_v33 }
 0x51e   :  { %3557 = vmatpush3.bf16.msra.mxu0 %v3763_v4  ;;  %3563 = vmatpush3.bf16.msra.mxu1 %v3778_v9  ;;  %v2827_v4 = vld [vmem:[%s4237_s0 + $0x28] sm:$0xff] }
 0x51f   :  { %3558 = vmatprep.subr.bf16.mxu0 %v3734_v0  ;;  %3564 = vmatprep.subr.bf16.mxu1 %v3734_v0  ;;  %v2830_v9 = vld [vmem:[%s4237_s0 + $0x68] sm:$0xff] }
 0x520   :  { %3331 = vmatprep.mubr.msk.f32.mxu0 %vm3735_vm0, %v3736_v8  ;;  %3342 = vmatprep.mubr.msk.f32.mxu1 %vm3735_vm0, %v3736_v8 }
 0x522   :  { %3560 = vmatpush3.bf16.msra.mxu0 %v3787_v12  ;;  %3566 = vmatpush3.bf16.msra.mxu1 %v3791_v13 }
 0x523   :  { %3567 = vmatprep.subr.bf16.mxu0 %v3734_v0  ;;  %3573 = vmatprep.subr.bf16.mxu1 %v3734_v0 }
 0x5e8   :  { %v1773_v34 = vpop.f32.mrb[20].mxu0  ;;  %v1856_v35 = vpop.f32.mrb[20].mxu1 }
 0x5e9   :  { %v1777_v36 = vadd.f32 %v2827_v4, %v1773_v34  ;;  %v1860_v37 = vadd.f32 %v2830_v9, %v1856_v35  ;;  %v3289_v38 = vpop.f32.mrb[21].mxu0  ;;  %v3300_v12 = vpop.f32.mrb[21].mxu1  ;;  %v2861_v4 = vld [vmem:[%s4237_s0 + $0xb0] sm:$0xff] }
 0x5eb   :  { %v2829_v39 = vmul.f32 -1.442695, %v1777_v36  ;;  %v2836_v13 = vmul.f32 -1.442695, %v1860_v37 }
 0x5ed   :  { %3686 = vpow2.f32 %v2829_v39 }
 0x5ee   :  { %3688 = vpow2.f32 %v2836_v13 }
 0x5f0   :  { %v1939_v41 = vpop.f32.mrb[22].mxu0  ;;  %v2017_v42 = vpop.f32.mrb[22].mxu1 }
 0x5f1   :  { %v2021_v43 = vadd.f32 %v2843_v40, %v2017_v42  ;;  %v3311_v44 = vpop.f32.mrb[23].mxu0  ;;  %v3322_v45 = vpop.f32.mrb[23].mxu1  ;;  %v1943_v48 = vadd.f32 %v2837_v46, %v1939_v41  ;;  %v2887_v46 = vld [vmem:[%s4236_s1 + $0x48] sm:$0xff] }
 0x5f2   :  { %v2886_v45 = vld [vmem:[%s4236_s1 + $0x40] sm:$0xff] }
 0x5f3   :  { %v2849_v47 = vmul.f32 -1.442695, %v2021_v43 }
 0x5f5   :  { %3690 = vpow2.f32 %v2849_v47  ;;  %v2892_v47 = vld [vmem:[%s4236_s1 + $0x60] sm:$0xff] }
 0x5f6   :  { %3692 = vtanh.f32 %v1943_v48  ;;  %v2893_v48 = vld [vmem:[%s4236_s1 + $0x68] sm:$0xff] }
 0x5f7   :  { %v3687_v49 = vpop.eup %3686 }
 0x5f8   :  { %v3689_v50 = vpop.eup %3688  ;;  %v1781_v51 = vadd.f32 1.0, %v3687_v49 }
 0x5f9   :  { %v1864_v52 = vadd.f32 1.0, %v3689_v50 }
 0x5fa   :  { %3694 = vrcp.f32 %v1781_v51  ;;  %v3592_v51 = vpack.c.bf16 %v2887_v46, %v2886_v45 }
 0x5fb   :  { %3696 = vrcp.f32 %v1864_v52  ;;  %v3598_v52 = vpack.c.bf16 %v2893_v48, %v2892_v47 }
 0x5ff   :  { %v3691_v53 = vpop.eup %3690 }
 0x600   :  { %v3693_v54 = vpop.eup %3692  ;;  %v2025_v58 = vadd.f32 1.0, %v3691_v53  ;;  %v2888_v53 = vld [vmem:[%s4236_s1 + $0x50] sm:$0xff] }
 0x602   :  { %3698 = vrcp.f32 %v2025_v58 }
 0x604   :  { %v3695_v55 = vpop.eup %3694 }
 0x605   :  { %v3697_v56 = vpop.eup %3696  ;;  %v2029_v57 = vmul.f32 %v3695_v55, %v3693_v54  ;;  %v2889_v55 = vld [vmem:[%s4236_s1 + $0x58] sm:$0xff] }
 0x606   :  { %v2028_v59 = vmul.f32 %v3697_v56, %v4062_v30  ;;  %v2894_v56 = vld [vmem:[%s4236_s1 + $0x70] sm:$0xff]  ;;  %v3595_v58 = vpack.c.bf16 %v2889_v55, %v2888_v53 }
 0x608   :  { %v4110_v60 = vadd.f32 %v2029_v57, %v2028_v59  ;;  %v2895_v57 = vld [vmem:[%s4236_s1 + $0x78] sm:$0xff] }
 0x609   :  { %v3601_v59 = vpack.c.bf16 %v2895_v57, %v2894_v56 }
 0x60a   :  { %3700 = vtanh.f32 %v4110_v60 }
 0x60c   :  { %v3699_v61 = vpop.eup %3698 }
 0x614   :  { %v3701_v62 = vpop.eup %3700 }
 0x615   :  { %v2032_v63 = vmul.f32 %v3701_v62, %v3699_v61 }
 0x617   :  { %2850 = vst.msk [vmem:[%s4238_s2 + $0x28] sm:$0xff] %vm16_vm1, %v2032_v63  ;;  %3332 = vmatmul.mubr.msk.f32.vlgmr.msra.gmra.mrb[24].mxu0 %vm16_vm1, %v2032_v63  ;;  %3343 = vmatmul.mubr.msk.f32.vlgmr.msra.gmra.mrb[24].mxu1 %vm16_vm1, %v2032_v63 }
 0x618   :  { %3569 = vmatpush3.bf16.msra.mxu0 %v3807_v18  ;;  %3575 = vmatpush3.bf16.msra.mxu1 %v3811_v19  ;;  %v2374_v18 = vld [vmem:[%s4236_s1] sm:$0xff]  ;;  %v2375_v19 = vld [vmem:[%s4236_s1 + $0x8] sm:$0xff] }
 0x619   :  { %3570 = vmatprep.subr.bf16.mxu0 %v3734_v0  ;;  %3576 = vmatprep.subr.bf16.mxu1 %v3734_v0 }
 0x61a   :  { %3353 = vmatprep.mubr.msk.f32.mxu0 %vm3735_vm0, %v3736_v8  ;;  %3364 = vmatprep.mubr.msk.f32.mxu1 %vm3735_vm0, %v3736_v8 }
 0x61c   :  { %3572 = vmatpush3.bf16.msra.mxu0 %v3829_v24  ;;  %3578 = vmatpush3.bf16.msra.mxu1 %v3833_v25  ;;  %v2879_v24 = vld [vmem:[%s4236_s1 + $0x20] sm:$0xff]  ;;  %v3580_v25 = vpack.c.bf16 %v2375_v19, %v2374_v18 }
 0x61d   :  { %3579 = vmatprep.subr.bf16.mxu0 %v3734_v0  ;;  %3585 = vmatprep.subr.bf16.mxu1 %v3734_v0  ;;  %v3586_v5 = vpack.c.bf16 %v2880_v1, %v2879_v24  ;;  %v2891_v1 = vld [vmem:[%s4237_s0 + $0xf8] sm:$0xff] }
 0x61f   :  { %3354 = vmatmul.mubr.msk.f32.vlgmr.msra.gmra.mrb[26].mxu0 %vm16_vm1, %v2032_v63  ;;  %3365 = vmatmul.mubr.msk.f32.vlgmr.msra.gmra.mrb[26].mxu1 %vm16_vm1, %v2032_v63 }
 0x620   :  { %3375 = vmatprep.mubr.msk.f32.mxu0 %vm3735_vm0, %v3736_v8  ;;  %3386 = vmatprep.mubr.msk.f32.mxu1 %vm3735_vm0, %v3736_v8 }
 0x621   :  { %3581 = vmatpush3.bf16.msra.mxu0 %v3580_v25  ;;  %3587 = vmatpush3.bf16.msra.mxu1 %v3586_v5 }
 0x622   :  { %3582 = vmatprep.subr.bf16.mxu0 %v3734_v0  ;;  %3588 = vmatprep.subr.bf16.mxu1 %v3734_v0 }
 0x625   :  { %3584 = vmatpush3.bf16.msra.mxu0 %v3583_v10  ;;  %3590 = vmatpush3.bf16.msra.mxu1 %v3589_v11  ;;  %v2885_v10 = vld [vmem:[%s4237_s0 + $0xb8] sm:$0xff] }
 0x626   :  { %3591 = vmatprep.subr.bf16.mxu0 %v3734_v0  ;;  %3597 = vmatprep.subr.bf16.mxu1 %v3734_v0 }
 0x6ea   :  { %v2110_v16 = vpop.f32.mrb[24].mxu0  ;;  %v2193_v17 = vpop.f32.mrb[24].mxu1 }
 0x6eb   :  { %v2114_v20 = vadd.f32 %v2851_v14, %v2110_v16  ;;  %v2197_v21 = vadd.f32 %v2854_v15, %v2193_v17  ;;  %v3333_v22 = vpop.f32.mrb[25].mxu0  ;;  %v3344_v23 = vpop.f32.mrb[25].mxu1 }
 0x6ed   :  { %v2853_v26 = vmul.f32 -1.442695, %v2114_v20  ;;  %v2860_v27 = vmul.f32 -1.442695, %v2197_v21 }
 0x6ef   :  { %3702 = vpow2.f32 %v2853_v26 }
 0x6f0   :  { %3704 = vpow2.f32 %v2860_v27 }
 0x6f2   :  { %v2276_v29 = vpop.f32.mrb[26].mxu0  ;;  %v2354_v30 = vpop.f32.mrb[26].mxu1 }
 0x6f3   :  { %v2358_v31 = vadd.f32 %v2867_v28, %v2354_v30  ;;  %v3355_v32 = vpop.f32.mrb[27].mxu0  ;;  %v3366_v33 = vpop.f32.mrb[27].mxu1  ;;  %v2280_v34 = vadd.f32 %v2861_v4, %v2276_v29 }
 0x6f5   :  { %v2873_v9 = vmul.f32 -1.442695, %v2358_v31 }
 0x6f7   :  { %3706 = vpow2.f32 %v2873_v9 }
 0x6f8   :  { %3708 = vtanh.f32 %v2280_v34 }
 0x6f9   :  { %v3703_v35 = vpop.eup %3702 }
 0x6fa   :  { %v3705_v36 = vpop.eup %3704  ;;  %v2118_v37 = vadd.f32 1.0, %v3703_v35 }
 0x6fb   :  { %v2201_v38 = vadd.f32 1.0, %v3705_v36 }
 0x6fc   :  { %3710 = vrcp.f32 %v2118_v37 }
 0x6fd   :  { %3712 = vrcp.f32 %v2201_v38 }
 0x701   :  { %v3707_v12 = vpop.eup %3706 }
 0x702   :  { %v3709_v39 = vpop.eup %3708  ;;  %v2362_v42 = vadd.f32 1.0, %v3707_v12 }
 0x704   :  { %3714 = vrcp.f32 %v2362_v42 }
 0x706   :  { %v3711_v13 = vpop.eup %3710 }
 0x707   :  { %v3713_v40 = vpop.eup %3712  ;;  %v2366_v41 = vmul.f32 %v3711_v13, %v3709_v39 }
 0x708   :  { %v2365_v43 = vmul.f32 %v3713_v40, %v4110_v60  ;;  %v2875_v60 = vld [vmem:[%s4237_s0 + $0x38] sm:$0xff] }
 0x70a   :  { %v4178_v44 = vadd.f32 %v2366_v41, %v2365_v43 }
 0x70c   :  { %3716 = vtanh.f32 %v4178_v44 }
 0x70e   :  { %v3715_v49 = vpop.eup %3714 }
 0x716   :  { %v3717_v50 = vpop.eup %3716 }
 0x717   :  { %v2369_v54 = vmul.f32 %v3717_v50, %v3715_v49 }
 0x719   :  { %2874 = vst.msk [vmem:[%s4238_s2 + $0x30] sm:$0xff] %vm16_vm1, %v2369_v54  ;;  %3376 = vmatmul.mubr.msk.f32.vlgmr.msra.gmra.mrb[28].mxu0 %vm16_vm1, %v2369_v54  ;;  %3387 = vmatmul.mubr.msk.f32.vlgmr.msra.gmra.mrb[28].mxu1 %vm16_vm1, %v2369_v54 }
 0x71a   :  { %3593 = vmatpush3.bf16.msra.mxu0 %v3592_v51  ;;  %3599 = vmatpush3.bf16.msra.mxu1 %v3598_v52 }
 0x71b   :  { %3594 = vmatprep.subr.bf16.mxu0 %v3734_v0  ;;  %3600 = vmatprep.subr.bf16.mxu1 %v3734_v0  ;;  %v2878_v0 = vld [vmem:[%s4237_s0 + $0x78] sm:$0xff] }
 0x71c   :  { %3397 = vmatprep.mubr.msk.f32.mxu0 %vm3735_vm0, %v3736_v8  ;;  %3408 = vmatprep.mubr.msk.f32.mxu1 %vm3735_vm0, %v3736_v8 }
 0x71e   :  { %3596 = vmatpush3.bf16.msra.mxu0 %v3595_v58  ;;  %3602 = vmatpush3.bf16.msra.mxu1 %v3601_v59 }
 0x721   :  { %3398 = vmatmul.mubr.msk.f32.vlgmr.msra.gmra.mrb[30].mxu0 %vm16_vm1, %v2369_v54  ;;  %3409 = vmatmul.mubr.msk.f32.vlgmr.msra.gmra.mrb[30].mxu1 %vm16_vm1, %v2369_v54 }
 0x7ec   :  { %v2447_v61 = vpop.f32.mrb[28].mxu0  ;;  %v2530_v62 = vpop.f32.mrb[28].mxu1 }
 0x7ed   :  { %v2451_v63 = vadd.f32 %v2875_v60, %v2447_v61  ;;  %v2534_v18 = vadd.f32 %v2878_v0, %v2530_v62  ;;  %v3377_v19 = vpop.f32.mrb[29].mxu0  ;;  %v3388_v8 = vpop.f32.mrb[29].mxu1 }
 0x7ef   :  { %v2877_v24 = vmul.f32 -1.442695, %v2451_v63  ;;  %v2884_v25 = vmul.f32 -1.442695, %v2534_v18 }
 0x7f1   :  { %3718 = vpow2.f32 %v2877_v24 }
 0x7f2   :  { %3720 = vpow2.f32 %v2884_v25 }
 0x7f4   :  { %v2613_v2 = vpop.f32.mrb[30].mxu0  ;;  %v2691_v3 = vpop.f32.mrb[30].mxu1 }
 0x7f5   :  { %v2695_v5 = vadd.f32 %v2891_v1, %v2691_v3  ;;  %v3399_v6 = vpop.f32.mrb[31].mxu0  ;;  %v3410_v7 = vpop.f32.mrb[31].mxu1  ;;  %v2617_v14 = vadd.f32 %v2885_v10, %v2613_v2 }
 0x7f7   :  { %v2897_v11 = vmul.f32 -1.442695, %v2695_v5 }
 0x7f9   :  { %3722 = vpow2.f32 %v2897_v11 }
 0x7fa   :  { %3724 = vtanh.f32 %v2617_v14 }
 0x7fb   :  { %v3719_v15 = vpop.eup %3718 }
 0x7fc   :  { %v3721_v16 = vpop.eup %3720  ;;  %v2455_v17 = vadd.f32 1.0, %v3719_v15 }
 0x7fd   :  { %v2538_v20 = vadd.f32 1.0, %v3721_v16 }
 0x7fe   :  { %3726 = vrcp.f32 %v2455_v17 }
 0x7ff   :  { %3728 = vrcp.f32 %v2538_v20 }
 0x803   :  { %v3723_v21 = vpop.eup %3722 }
 0x804   :  { %v3725_v22 = vpop.eup %3724  ;;  %v2699_v28 = vadd.f32 1.0, %v3723_v21 }
 0x806   :  { %3730 = vrcp.f32 %v2699_v28 }
 0x808   :  { %v3727_v23 = vpop.eup %3726 }
 0x809   :  { %v3729_v26 = vpop.eup %3728  ;;  %v2703_v27 = vmul.f32 %v3727_v23, %v3725_v22 }
 0x80a   :  { %v2702_v29 = vmul.f32 %v3729_v26, %v4178_v44 }
 0x80c   :  { %v2704_v30 = vadd.f32 %v2703_v27, %v2702_v29 }
 0x80e   :  { %3732 = vtanh.f32 %v2704_v30 }
 0x810   :  { %v3731_v31 = vpop.eup %3730 }
 0x818   :  { %v3733_v32 = vpop.eup %3732 }
 0x819   :  { %v2706_v33 = vmul.f32 %v3733_v32, %v3731_v31 }
 0x81b   :  { %2898 = vst.msk [vmem:[%s4238_s2 + $0x38] sm:$0xff] %vm16_vm1, %v2706_v33 }

</bundles_post_ra>
